<compile_context>
chip_gen: v7x
topology: tpu7x:2x2x1
jax: 0.10.0
libtpu: 0.0.40
codegen_flags: <defaults>
</compile_context>

<pallas_src>
import jax
import jax.numpy as jnp
from jax.experimental import pallas as pl
from jax.experimental.pallas import tpu as pltpu

INPUT_DIM = 500
HIDDEN_DIM = 400
LATENT_DIM = 20
OUTPUT_DIM = 28 * 28  # 784

# Lane-aligned (multiple of 128) padded sizes.
INPUT_PAD = 512
HIDDEN_PAD = 512
LATENT_PAD = 128
OUTPUT_PAD = 896

MAX_TILE_B = 256  # max batch rows per grid step


def ae_kernel(x_ref, w1_ref, b1_ref, w2_ref, b2_ref,
              w3_ref, b3_ref, w4_ref, b4_ref,
              recon_ref, z_ref):
    bf16 = jnp.bfloat16

    # encode: h1 = relu(x @ W1 + b1); z = h1 @ W2 + b2
    x = x_ref[...]  # already bf16
    h1 = jnp.dot(x, w1_ref[...], preferred_element_type=jnp.float32) + b1_ref[...]
    h1 = jnp.maximum(h1, 0.0)
    z = jnp.dot(h1.astype(bf16), w2_ref[...],
                preferred_element_type=jnp.float32) + b2_ref[...]

    # decode: h3 = relu(z @ W3 + b3); recon = sigmoid(h3 @ W4 + b4)
    h3 = jnp.dot(z.astype(bf16), w3_ref[...],
                 preferred_element_type=jnp.float32) + b3_ref[...]
    h3 = jnp.maximum(h3, 0.0)
    logits = jnp.dot(h3.astype(bf16), w4_ref[...],
                     preferred_element_type=jnp.float32) + b4_ref[...]

    recon_ref[...] = jax.nn.sigmoid(logits)
    z_ref[...] = z  # padded lanes 20: are exactly 0 (zero-padded W2 / b2)


def _tile_b(batch):
    # second-to-last block dim must be a multiple of 8
    return min(MAX_TILE_B, max(8, ((batch + 7) // 8) * 8))


def ae_forward(x, packed_params):
    """Mirrors AE.forward: x.view(-1, input_dim) -> (recon, z)."""
    x2d = x.reshape(-1, INPUT_DIM)
    B = x2d.shape[0]
    tile_b = _tile_b(B)
    Bp = pl.cdiv(B, tile_b) * tile_b

    # Pad batch to a tile_b multiple and features to 512 lanes (zeros), bf16.
    x_pad = (jnp.zeros((Bp, INPUT_PAD), jnp.bfloat16)
             .at[:B, :INPUT_DIM].set(x2d.astype(jnp.bfloat16)))

    w1, b1, w2, b2, w3, b3, w4, b4 = packed_params

    resident = lambda shape: pl.BlockSpec(shape, lambda i: (0, 0))

    recon_p, z_p = pl.pallas_call(
        ae_kernel,
        out_shape=(
            jax.ShapeDtypeStruct((Bp, OUTPUT_PAD), jnp.float32),
            jax.ShapeDtypeStruct((Bp, LATENT_PAD), jnp.float32),
        ),
        grid=(Bp // tile_b,),
        in_specs=[
            pl.BlockSpec((tile_b, INPUT_PAD), lambda i: (i, 0)),
            resident((INPUT_PAD, HIDDEN_PAD)), resident((1, HIDDEN_PAD)),
            resident((HIDDEN_PAD, LATENT_PAD)), resident((1, LATENT_PAD)),
            resident((LATENT_PAD, HIDDEN_PAD)), resident((1, HIDDEN_PAD)),
            resident((HIDDEN_PAD, OUTPUT_PAD)), resident((1, OUTPUT_PAD)),
        ],
        out_specs=(
            pl.BlockSpec((tile_b, OUTPUT_PAD), lambda i: (i, 0)),
            pl.BlockSpec((tile_b, LATENT_PAD), lambda i: (i, 0)),
        ),
        compiler_params=pltpu.CompilerParams(
            dimension_semantics=("parallel",),
            vmem_limit_bytes=32 << 20,
        ),
    )(x_pad, w1, b1, w2, b2, w3, b3, w4, b4)

    return recon_p[:B, :OUTPUT_DIM], z_p[:B, :LATENT_DIM]


def init_params(key):
    """PyTorch-Linear-style init: uniform(-1/sqrt(fan_in), 1/sqrt(fan_in)).

    Weights are (in_features, out_features) f32, biases are (out_features,) f32.
    """
    def linear(key, fan_in, fan_out):
        kw, kb = jax.random.split(key)
        bound = 1.0 / jnp.sqrt(fan_in)
        w = jax.random.uniform(kw, (fan_in, fan_out), jnp.float32, -bound, bound)
        b = jax.random.uniform(kb, (fan_out,), jnp.float32, -bound, bound)
        return w, b

    k1, k2, k3, k4 = jax.random.split(key, 4)
    w1, b1 = linear(k1, INPUT_DIM, HIDDEN_DIM)
    w2, b2 = linear(k2, HIDDEN_DIM, LATENT_DIM)
    w3, b3 = linear(k3, LATENT_DIM, HIDDEN_DIM)
    w4, b4 = linear(k4, HIDDEN_DIM, OUTPUT_DIM)
    return (w1, b1, w2, b2, w3, b3, w4, b4)


def pack_params(params):
    """One-time pack: zero-pad every dim to a lane multiple, cast weights to bf16.

    Done once outside the per-call path so weights are not re-padded / re-cast
    every forward call.  Zero padding keeps the forward math exact.
    """
    w1, b1, w2, b2, w3, b3, w4, b4 = params

    def pad_w(w, rows, cols):
        return (jnp.zeros((rows, cols), jnp.float32)
                .at[:w.shape[0], :w.shape[1]].set(w).astype(jnp.bfloat16))

    def pad_b(b, cols):
        return jnp.zeros((1, cols), jnp.float32).at[0, :b.shape[0]].set(b)

    return (
        pad_w(w1, INPUT_PAD, HIDDEN_PAD), pad_b(b1, HIDDEN_PAD),
        pad_w(w2, HIDDEN_PAD, LATENT_PAD), pad_b(b2, LATENT_PAD),
        pad_w(w3, LATENT_PAD, HIDDEN_PAD), pad_b(b3, HIDDEN_PAD),
        pad_w(w4, HIDDEN_PAD, OUTPUT_PAD), pad_b(b4, OUTPUT_PAD),
    )


def ae_forward_ref(x, params):
    """Pure-JAX reference mimicking the kernel's bf16-dot / f32-accumulate math."""
    x2d = x.reshape(-1, INPUT_DIM).astype(jnp.float32)
    w1, b1, w2, b2, w3, b3, w4, b4 = params
    bf = lambda a: a.astype(jnp.bfloat16)
    dot = lambda a, w: jnp.dot(bf(a), bf(w), preferred_element_type=jnp.float32)
    h1 = jnp.maximum(dot(x2d, w1) + b1, 0.0)
    z = dot(h1, w2) + b2
    h3 = jnp.maximum(dot(z, w3) + b3, 0.0)
    recon = jax.nn.sigmoid(dot(h3, w4) + b4)
    return recon, z


if __name__ == "__main__":
    key = jax.random.PRNGKey(0)
    kx, kp = jax.random.split(key)

    params = init_params(kp)          # f32, native shapes (PyTorch-equivalent)
    packed = pack_params(params)      # bf16 weights, lane-aligned padding

    # Small batch; forward flattens everything beyond the feature dim.
    x = jax.random.normal(kx, (2, INPUT_DIM), jnp.float32)

    recon, z = jax.jit(ae_forward)(x, packed)
    jax.block_until_ready((recon, z))

    recon_ref, z_ref = ae_forward_ref(x, params)
    assert recon.shape == (2, OUTPUT_DIM) and z.shape == (2, LATENT_DIM)
    assert jnp.allclose(recon, recon_ref, atol=1e-3, rtol=1e-3)
    assert jnp.allclose(z, z_ref, atol=1e-3, rtol=1e-3)

    print("KERNEL_OK")
</pallas_src>

<mosaic_0001>
module attributes {stable_mosaic.version = 11 : i64} {
  func.func @ae_kernel(%arg0: i32, %arg1: memref<8x512xbf16, #tpu.memory_space<vmem>>, %arg2: memref<512x512xbf16, #tpu.memory_space<vmem>>, %arg3: memref<1x512xf32, #tpu.memory_space<vmem>>, %arg4: memref<512x128xbf16, #tpu.memory_space<vmem>>, %arg5: memref<1x128xf32, #tpu.memory_space<vmem>>, %arg6: memref<128x512xbf16, #tpu.memory_space<vmem>>, %arg7: memref<1x512xf32, #tpu.memory_space<vmem>>, %arg8: memref<512x896xbf16, #tpu.memory_space<vmem>>, %arg9: memref<1x896xf32, #tpu.memory_space<vmem>>, %arg10: memref<8x896xf32, #tpu.memory_space<vmem>>, %arg11: memref<8x128xf32, #tpu.memory_space<vmem>>) attributes {dimension_semantics = [#tpu.dimension_semantics<parallel>], iteration_bounds = array<i64: 1>, scalar_prefetch = 0 : i64, scratch_operands = 0 : i64, tpu.core_type = #tpu.core_type<tc>, window_params = [{transform_indices = @transform_0, window_bounds = array<i64: 8, 512>}, {pipeline_mode = #tpu.pipeline_mode<synchronous>, transform_indices = @transform_1, window_bounds = array<i64: 512, 512>}, {pipeline_mode = #tpu.pipeline_mode<synchronous>, transform_indices = @transform_2, window_bounds = array<i64: 1, 512>}, {pipeline_mode = #tpu.pipeline_mode<synchronous>, transform_indices = @transform_3, window_bounds = array<i64: 512, 128>}, {pipeline_mode = #tpu.pipeline_mode<synchronous>, transform_indices = @transform_4, window_bounds = array<i64: 1, 128>}, {pipeline_mode = #tpu.pipeline_mode<synchronous>, transform_indices = @transform_5, window_bounds = array<i64: 128, 512>}, {pipeline_mode = #tpu.pipeline_mode<synchronous>, transform_indices = @transform_6, window_bounds = array<i64: 1, 512>}, {pipeline_mode = #tpu.pipeline_mode<synchronous>, transform_indices = @transform_7, window_bounds = array<i64: 512, 896>}, {pipeline_mode = #tpu.pipeline_mode<synchronous>, transform_indices = @transform_8, window_bounds = array<i64: 1, 896>}, {transform_indices = @transform_9, window_bounds = array<i64: 8, 896>}, {transform_indices = @transform_10, window_bounds = array<i64: 8, 128>}]} {
    %c0 = arith.constant 0 : index
    %c0_0 = arith.constant 0 : index
    %0 = vector.load %arg1[%c0, %c0_0] : memref<8x512xbf16, #tpu.memory_space<vmem>>, vector<8x512xbf16>
    %c0_1 = arith.constant 0 : index
    %c0_2 = arith.constant 0 : index
    %1 = vector.load %arg2[%c0_1, %c0_2] : memref<512x512xbf16, #tpu.memory_space<vmem>>, vector<512x512xbf16>
    %cst = arith.constant dense<0.000000e+00> : vector<8x512xf32>
    %2 = tpu.matmul %0, %1, %cst {dimension_numbers = #tpu.dot_dimension_numbers<[1], [0], [0], [1], [0, 0, 1, 1], [], []>} : vector<8x512xbf16>, vector<512x512xbf16>, vector<8x512xf32> -> vector<8x512xf32>
    %c0_3 = arith.constant 0 : index
    %c0_4 = arith.constant 0 : index
    %3 = vector.load %arg3[%c0_3, %c0_4] : memref<1x512xf32, #tpu.memory_space<vmem>>, vector<1x512xf32>
    %4 = vector.broadcast %3 : vector<1x512xf32> to vector<8x512xf32>
    %5 = arith.addf %2, %4 : vector<8x512xf32>
    %cst_5 = arith.constant 0.000000e+00 : f32
    %6 = vector.broadcast %cst_5 : f32 to vector<8x512xf32>
    %7 = arith.maximumf %5, %6 : vector<8x512xf32>
    %8 = arith.truncf %7 : vector<8x512xf32> to vector<8x512xbf16>
    %c0_6 = arith.constant 0 : index
    %c0_7 = arith.constant 0 : index
    %9 = vector.load %arg4[%c0_6, %c0_7] : memref<512x128xbf16, #tpu.memory_space<vmem>>, vector<512x128xbf16>
    %cst_8 = arith.constant dense<0.000000e+00> : vector<8x128xf32>
    %10 = tpu.matmul %8, %9, %cst_8 {dimension_numbers = #tpu.dot_dimension_numbers<[1], [0], [0], [1], [0, 0, 1, 1], [], []>} : vector<8x512xbf16>, vector<512x128xbf16>, vector<8x128xf32> -> vector<8x128xf32>
    %c0_9 = arith.constant 0 : index
    %c0_10 = arith.constant 0 : index
    %11 = vector.load %arg5[%c0_9, %c0_10] : memref<1x128xf32, #tpu.memory_space<vmem>>, vector<1x128xf32>
    %12 = vector.broadcast %11 : vector<1x128xf32> to vector<8x128xf32>
    %13 = arith.addf %10, %12 : vector<8x128xf32>
    %14 = arith.truncf %13 : vector<8x128xf32> to vector<8x128xbf16>
    %c0_11 = arith.constant 0 : index
    %c0_12 = arith.constant 0 : index
    %15 = vector.load %arg6[%c0_11, %c0_12] : memref<128x512xbf16, #tpu.memory_space<vmem>>, vector<128x512xbf16>
    %cst_13 = arith.constant dense<0.000000e+00> : vector<8x512xf32>
    %16 = tpu.matmul %14, %15, %cst_13 {dimension_numbers = #tpu.dot_dimension_numbers<[1], [0], [0], [1], [0, 0, 1, 1], [], []>} : vector<8x128xbf16>, vector<128x512xbf16>, vector<8x512xf32> -> vector<8x512xf32>
    %c0_14 = arith.constant 0 : index
    %c0_15 = arith.constant 0 : index
    %17 = vector.load %arg7[%c0_14, %c0_15] : memref<1x512xf32, #tpu.memory_space<vmem>>, vector<1x512xf32>
    %18 = vector.broadcast %17 : vector<1x512xf32> to vector<8x512xf32>
    %19 = arith.addf %16, %18 : vector<8x512xf32>
    %cst_16 = arith.constant 0.000000e+00 : f32
    %20 = vector.broadcast %cst_16 : f32 to vector<8x512xf32>
    %21 = arith.maximumf %19, %20 : vector<8x512xf32>
    %22 = arith.truncf %21 : vector<8x512xf32> to vector<8x512xbf16>
    %c0_17 = arith.constant 0 : index
    %c0_18 = arith.constant 0 : index
    %23 = vector.load %arg8[%c0_17, %c0_18] : memref<512x896xbf16, #tpu.memory_space<vmem>>, vector<512x896xbf16>
    %cst_19 = arith.constant dense<0.000000e+00> : vector<8x896xf32>
    %24 = tpu.matmul %22, %23, %cst_19 {dimension_numbers = #tpu.dot_dimension_numbers<[1], [0], [0], [1], [0, 0, 1, 1], [], []>} : vector<8x512xbf16>, vector<512x896xbf16>, vector<8x896xf32> -> vector<8x896xf32>
    %c0_20 = arith.constant 0 : index
    %c0_21 = arith.constant 0 : index
    %25 = vector.load %arg9[%c0_20, %c0_21] : memref<1x896xf32, #tpu.memory_space<vmem>>, vector<1x896xf32>
    %26 = vector.broadcast %25 : vector<1x896xf32> to vector<8x896xf32>
    %27 = arith.addf %24, %26 : vector<8x896xf32>
    %28 = arith.negf %27 : vector<8x896xf32>
    %29 = math.exp %28 : vector<8x896xf32>
    %cst_22 = arith.constant 1.000000e+00 : f32
    %30 = vector.broadcast %cst_22 : f32 to vector<8x896xf32>
    %31 = arith.addf %30, %29 : vector<8x896xf32>
    %32 = arith.divf %30, %31 : vector<8x896xf32>
    %c0_23 = arith.constant 0 : index
    %c0_24 = arith.constant 0 : index
    %33 = vector.load %arg10[%c0_23, %c0_24] : memref<8x896xf32, #tpu.memory_space<vmem>>, vector<8x896xf32>
    tpu.vector_store %arg10[%c0_23, %c0_24], %32 {strides = array<i32>} : memref<8x896xf32, #tpu.memory_space<vmem>>, vector<8x896xf32>,
    %c0_25 = arith.constant 0 : index
    %c0_26 = arith.constant 0 : index
    %34 = vector.load %arg11[%c0_25, %c0_26] : memref<8x128xf32, #tpu.memory_space<vmem>>, vector<8x128xf32>
    tpu.vector_store %arg11[%c0_25, %c0_26], %13 {strides = array<i32>} : memref<8x128xf32, #tpu.memory_space<vmem>>, vector<8x128xf32>,
    return
  }
  func.func @transform_0(%arg0: i32) -> (i32, i32) {
    %c0_i32 = arith.constant 0 : i32
    %c0_i32_0 = arith.constant 0 : i32
    return %arg0, %c0_i32 : i32, i32
  }
  func.func @transform_1(%arg0: i32) -> (i32, i32) {
    %c0_i32 = arith.constant 0 : i32
    %c0_i32_0 = arith.constant 0 : i32
    %c0_i32_1 = arith.constant 0 : i32
    return %c0_i32, %c0_i32_0 : i32, i32
  }
  func.func @transform_2(%arg0: i32) -> (i32, i32) {
    %c0_i32 = arith.constant 0 : i32
    %c0_i32_0 = arith.constant 0 : i32
    %c0_i32_1 = arith.constant 0 : i32
    return %c0_i32, %c0_i32_0 : i32, i32
  }
  func.func @transform_3(%arg0: i32) -> (i32, i32) {
    %c0_i32 = arith.constant 0 : i32
    %c0_i32_0 = arith.constant 0 : i32
    %c0_i32_1 = arith.constant 0 : i32
    return %c0_i32, %c0_i32_0 : i32, i32
  }
  func.func @transform_4(%arg0: i32) -> (i32, i32) {
    %c0_i32 = arith.constant 0 : i32
    %c0_i32_0 = arith.constant 0 : i32
    %c0_i32_1 = arith.constant 0 : i32
    return %c0_i32, %c0_i32_0 : i32, i32
  }
  func.func @transform_5(%arg0: i32) -> (i32, i32) {
    %c0_i32 = arith.constant 0 : i32
    %c0_i32_0 = arith.constant 0 : i32
    %c0_i32_1 = arith.constant 0 : i32
    return %c0_i32, %c0_i32_0 : i32, i32
  }
  func.func @transform_6(%arg0: i32) -> (i32, i32) {
    %c0_i32 = arith.constant 0 : i32
    %c0_i32_0 = arith.constant 0 : i32
    %c0_i32_1 = arith.constant 0 : i32
    return %c0_i32, %c0_i32_0 : i32, i32
  }
  func.func @transform_7(%arg0: i32) -> (i32, i32) {
    %c0_i32 = arith.constant 0 : i32
    %c0_i32_0 = arith.constant 0 : i32
    %c0_i32_1 = arith.constant 0 : i32
    return %c0_i32, %c0_i32_0 : i32, i32
  }
  func.func @transform_8(%arg0: i32) -> (i32, i32) {
    %c0_i32 = arith.constant 0 : i32
    %c0_i32_0 = arith.constant 0 : i32
    %c0_i32_1 = arith.constant 0 : i32
    return %c0_i32, %c0_i32_0 : i32, i32
  }
  func.func @transform_9(%arg0: i32) -> (i32, i32) {
    %c0_i32 = arith.constant 0 : i32
    %c0_i32_0 = arith.constant 0 : i32
    return %arg0, %c0_i32 : i32, i32
  }
  func.func @transform_10(%arg0: i32) -> (i32, i32) {
    %c0_i32 = arith.constant 0 : i32
    %c0_i32_0 = arith.constant 0 : i32
    return %arg0, %c0_i32 : i32, i32
  }
}

</mosaic_0001>

<bundles_post_ra>
// kernel: ae_forward.1
= control target key start
LH: loop header
LB: loop body
LE: loop exit
PB: predicated region body
PF: predicated region fallthrough
CT: control target
= control target key end

     0   :  { %16 = vsyncpa [#allocation3], 0  ;;  %s5063_s0 = inlined_call_operand.vmem [shape: bf16[8,512], index: 0, kind: input, shape index: {}]   ;;  %s5064_s1 = inlined_call_operand.hbm [shape: bf16[512,512], index: 1, kind: input, shape index: {}]   ;;  %s5065_s2 = inlined_call_operand.vmem [shape: f32[1,512], index: 2, kind: input, shape index: {}]   ;;  %s5066_s3 = inlined_call_operand.hbm [shape: bf16[512,128], index: 3, kind: input, shape index: {}]   ;;  %s5067_s4 = inlined_call_operand.vmem [shape: f32[1,128], index: 4, kind: input, shape index: {}]   ;;  %s5068_s5 = inlined_call_operand.hbm [shape: bf16[128,512], index: 5, kind: input, shape index: {}]   ;;  %s5069_s6 = inlined_call_operand.vmem [shape: f32[1,512], index: 6, kind: input, shape index: {}]   ;;  %s5070_s7 = inlined_call_operand.hbm [shape: bf16[512,896], index: 7, kind: input, shape index: {}]   ;;  %s5071_s8 = inlined_call_operand.vmem [shape: f32[1,896], index: 8, kind: input, shape index: {}]   ;;  %s5072_s9 = inlined_call_operand.vmem [shape: f32[8,896], index: 9, kind: output, shape index: {0}]   ;;  %s5073_s10 = inlined_call_operand.vmem [shape: f32[8,128], index: 10, kind: output, shape index: {1}]  }
   0x1   :  { %17 = vsyncpa [#allocation5], 0 }
   0x2   :  { %18 = vsyncpa [#allocation8], 0  ;;  %s4823_s13 = smov [#allocation4]   ;;  %s4729_s17 = scalar_lea.hbm %s5066_s3, 4096 }
   0x3   :  { %s40_s14 = sshll.u32 %s4823_s13, 4  ;;  %p4730_p0 = scmp.ne.s32.totalorder %s5066_s3, %s4729_s17  ;;  %s41_s14 = int_to_ptr.vmem [resolvable:$true] %s40_s14 }
   0x4   :  { %p4733_p1 = scmp.lt.u32.totalorder %s4729_s17, %s5066_s3 }
   0x6   :  { %p4735_p2 = pnand %p4733_p1, %p4730_p0 }
   0x8   :  { %4738 = shalt.err (!%p4735_p2)
}
   0x9   :  { %s4739_s22 = scalar_lea.vmem %s41_s14, 4096  ;;  %p4744_p4 = scmp.lt.s32.totalorder %s41_s14, %s41_s14 }
   0xa   :  { %p4740_p3 = scmp.ne.s32.totalorder %s41_s14, %s4739_s22  ;;  %p4745_p5 = scmp.lt.s32.totalorder %s4739_s22, %s4739_s22 }
   0xc   :  { %p4746_p6 = por %p4745_p5, %p4744_p4 }
   0xe   :  { %p4747_p7 = pnand %p4746_p6, %p4740_p3 }
  0x10   :  { %4750 = shalt.err (!%p4747_p7)
}
  0x11   :  { %s4824_s23 = smov 64   ;;  %s4825_s24 = smov 4  }
  0x12   :  { %46 = dma.hbm_to_vmem [thread:$0]  %s5066_s3, 4096, %s41_s14, [#allocation5], %s4824_s23, %s4824_s23, %s4825_s24  }
  0x13   :  { %s4826_s27 = smov [#allocation2]   ;;  %s4751_s11 = scalar_lea.hbm %s5064_s1, 16384 }
  0x14   :  { %s26_s28 = sshll.u32 %s4826_s27, 4  ;;  %p4752_p8 = scmp.ne.s32.totalorder %s5064_s1, %s4751_s11  ;;  %s27_s28 = int_to_ptr.vmem [resolvable:$true] %s26_s28 }
  0x15   :  { %p4755_p9 = scmp.lt.u32.totalorder %s4751_s11, %s5064_s1 }
  0x17   :  { %p4757_p10 = pnand %p4755_p9, %p4752_p8 }
  0x19   :  { %4760 = shalt.err (!%p4757_p10)
}
  0x1a   :  { %s4761_s17 = scalar_lea.vmem %s27_s28, 16384  ;;  %p4766_p12 = scmp.lt.s32.totalorder %s27_s28, %s27_s28 }
  0x1b   :  { %p4762_p11 = scmp.ne.s32.totalorder %s27_s28, %s4761_s17  ;;  %p4767_p13 = scmp.lt.s32.totalorder %s4761_s17, %s4761_s17 }
  0x1d   :  { %p4768_p0 = por %p4767_p13, %p4766_p12 }
  0x1f   :  { %p4769_p1 = pnand %p4768_p0, %p4762_p11 }
  0x21   :  { %4772 = shalt.err (!%p4769_p1)
}
  0x22   :  { %s4827_s3 = smov 256   ;;  %s4828_s14 = smov 16  }
  0x23   :  { %32 = dma.hbm_to_vmem [thread:$0]  %s5064_s1, 16384, %s27_s28, [#allocation3], %s4827_s3, %s4827_s3, %s4828_s14  }
  0x24   :  { %s4829_s20 = smov [#allocation6]   ;;  %s4830_s22 = smov [#allocation7]  }
  0x25   :  { %s54_s21 = sshll.u32 %s4829_s20, 4  ;;  %s68_s23 = sshll.u32 %s4830_s22, 4  ;;  %s55_s21 = int_to_ptr.vmem [resolvable:$true] %s54_s21  ;;  %s4913_s23 = int_to_ptr.vmem [resolvable:$true] %s68_s23 }
  0x26   :  { %s4773_s26 = scalar_lea.hbm %s5068_s5, 4096 }
  0x27   :  { %p4774_p2 = scmp.ne.s32.totalorder %s5068_s5, %s4773_s26  ;;  %p4777_p3 = scmp.lt.u32.totalorder %s4773_s26, %s5068_s5 }
  0x29   :  { %p4779_p4 = pnand %p4777_p3, %p4774_p2 }
  0x2b   :  { %4782 = shalt.err (!%p4779_p4)
}
  0x2c   :  { %s4783_s1 = scalar_lea.vmem %s55_s21, 4096  ;;  %p4788_p6 = scmp.lt.s32.totalorder %s55_s21, %s55_s21 }
  0x2d   :  { %p4784_p5 = scmp.ne.s32.totalorder %s55_s21, %s4783_s1  ;;  %p4789_p7 = scmp.lt.s32.totalorder %s4783_s1, %s4783_s1 }
  0x2f   :  { %p4790_p8 = por %p4789_p7, %p4788_p6 }
  0x31   :  { %p4791_p9 = pnand %p4790_p8, %p4784_p5 }
  0x33   :  { %4794 = shalt.err (!%p4791_p9)
}
  0x34   :  { %60 = dma.hbm_to_vmem [thread:$0]  %s5068_s5, 4096, %s55_s21, [#allocation5], %s4827_s3, %s4827_s3, %s4828_s14  }
  0x35   :  { %s4795_s16 = scalar_lea.hbm %s5070_s7, 28672 }
  0x36   :  { %p4796_p10 = scmp.ne.s32.totalorder %s5070_s7, %s4795_s16  ;;  %p4799_p11 = scmp.lt.u32.totalorder %s4795_s16, %s5070_s7 }
  0x38   :  { %p4801_p12 = pnand %p4799_p11, %p4796_p10 }
  0x3a   :  { %4804 = shalt.err (!%p4801_p12)
}
  0x3b   :  { %s4805_s22 = scalar_lea.vmem %s4913_s23, 28672  ;;  %p4810_p0 = scmp.lt.s32.totalorder %s4913_s23, %s4913_s23 }
  0x3c   :  { %p4806_p13 = scmp.ne.s32.totalorder %s4913_s23, %s4805_s22  ;;  %p4811_p1 = scmp.lt.s32.totalorder %s4805_s22, %s4805_s22 }
  0x3e   :  { %p4812_p2 = por %p4811_p1, %p4810_p0 }
  0x40   :  { %p4813_p3 = pnand %p4812_p2, %p4806_p13 }
  0x42   :  { %4816 = shalt.err (!%p4813_p3)
}
  0x43   :  { %s4831_s5 = smov 448   ;;  %s4832_s3 = smov 28  }
  0x44   :  { %74 = dma.hbm_to_vmem [thread:$0]  %s5070_s7, 28672, %s4913_s23, [#allocation8], %s4831_s5, %s4831_s5, %s4832_s3  }
  0x45   :  { %4817 = dma.done.wait [#allocation3], 16384  }
  0x46   :  { %4818 = vsyncadd [#allocation3], 4294950912 }
  0x47   :  { %4819 = dma.done.wait [#allocation5], 8192  }
  0x48   :  { %4820 = vsyncadd [#allocation5], 4294959104 }
  0x49   :  { %4821 = dma.done.wait [#allocation8], 28672  }
  0x4a   :  { %4822 = vsyncadd [#allocation8], 4294938624  ;;  %v4105_v0 = vld [vmem:[#allocation2 + $0x4] ss:$16 sps:$4 sm:$0xff]   ;;  %v4107_v1 = vld [vmem:[#allocation2 + $0xc] ss:$16 sps:$4 sm:$0xff]  }
  0x4b   :  { %896 = vmatprep.subr.bf16.mxu0 %v4105_v0  ;;  %v4109_v2 = vld [vmem:[#allocation2] ss:$16 sps:$4 sm:$0xff]   ;;  %v4110_v3 = vld [vmem:[#allocation2 + $0x8] ss:$16 sps:$4 sm:$0xff]   ;;  %978 = vmatprep.subr.bf16.mxu1 %v4107_v1  ;;  %v4111_v4 = vld [vmem:[#allocation2 + $0x24] ss:$16 sps:$4 sm:$0xff]  }
  0x4c   :  { %897 = vmatpush1.bf16.msra.mxu0 %v4109_v2  ;;  %979 = vmatpush1.bf16.msra.mxu1 %v4110_v3  ;;  %v4113_v5 = vld [vmem:[#allocation2 + $0x2c] ss:$16 sps:$4 sm:$0xff]   ;;  %v4115_v6 = vld [vmem:[#allocation2 + $0x20] ss:$16 sps:$4 sm:$0xff]   ;;  %v4116_v7 = vld [vmem:[#allocation2 + $0x28] ss:$16 sps:$4 sm:$0xff]  }
  0x4d   :  { %898 = vmatprep.subr.bf16.mxu0 %v4111_v4  ;;  %980 = vmatprep.subr.bf16.mxu1 %v4113_v5  ;;  %v4117_v8 = vld [vmem:[#allocation2 + $0x44] ss:$16 sps:$4 sm:$0xff]   ;;  %v4119_v9 = vld [vmem:[#allocation2 + $0x4c] ss:$16 sps:$4 sm:$0xff]   ;;  %v4121_v10 = vld [vmem:[#allocation2 + $0x40] ss:$16 sps:$4 sm:$0xff]  }
  0x4e   :  { %v4122_v11 = vld [vmem:[#allocation2 + $0x48] ss:$16 sps:$4 sm:$0xff]   ;;  %v4123_v12 = vld [vmem:[#allocation2 + $0x64] ss:$16 sps:$4 sm:$0xff]   ;;  %v4125_v13 = vld [vmem:[#allocation2 + $0x6c] ss:$16 sps:$4 sm:$0xff]  }
  0x4f   :  { %v4127_v14 = vld [vmem:[#allocation2 + $0x60] ss:$16 sps:$4 sm:$0xff]   ;;  %v4128_v15 = vld [vmem:[#allocation2 + $0x68] ss:$16 sps:$4 sm:$0xff]   ;;  %v4129_v16 = vld [vmem:[#allocation2 + $0x84] ss:$16 sps:$4 sm:$0xff]  }
  0x50   :  { %899 = vmatpush1.bf16.msra.mxu0 %v4115_v6  ;;  %981 = vmatpush1.bf16.msra.mxu1 %v4116_v7  ;;  %v4131_v17 = vld [vmem:[#allocation2 + $0x8c] ss:$16 sps:$4 sm:$0xff]   ;;  %v4133_v18 = vld [vmem:[#allocation2 + $0x80] ss:$16 sps:$4 sm:$0xff]   ;;  %v4134_v19 = vld [vmem:[#allocation2 + $0x88] ss:$16 sps:$4 sm:$0xff]  }
  0x51   :  { %900 = vmatprep.subr.bf16.mxu0 %v4117_v8  ;;  %982 = vmatprep.subr.bf16.mxu1 %v4119_v9  ;;  %v4135_v20 = vld [vmem:[#allocation2 + $0xa4] ss:$16 sps:$4 sm:$0xff]   ;;  %v4137_v21 = vld [vmem:[#allocation2 + $0xac] ss:$16 sps:$4 sm:$0xff]   ;;  %v4139_v22 = vld [vmem:[#allocation2 + $0xa0] ss:$16 sps:$4 sm:$0xff]  }
  0x52   :  { %v4140_v23 = vld [vmem:[#allocation2 + $0xa8] ss:$16 sps:$4 sm:$0xff]   ;;  %v4141_v24 = vld [vmem:[#allocation2 + $0xc4] ss:$16 sps:$4 sm:$0xff]   ;;  %v4143_v25 = vld [vmem:[#allocation2 + $0xcc] ss:$16 sps:$4 sm:$0xff]  }
  0x53   :  { %v4145_v26 = vld [vmem:[#allocation2 + $0xc0] ss:$16 sps:$4 sm:$0xff]   ;;  %v4146_v27 = vld [vmem:[#allocation2 + $0xc8] ss:$16 sps:$4 sm:$0xff]   ;;  %v4147_v28 = vld [vmem:[#allocation2 + $0xe4] ss:$16 sps:$4 sm:$0xff]  }
  0x54   :  { %901 = vmatpush1.bf16.msra.mxu0 %v4121_v10  ;;  %983 = vmatpush1.bf16.msra.mxu1 %v4122_v11  ;;  %v4149_v29 = vld [vmem:[#allocation2 + $0xec] ss:$16 sps:$4 sm:$0xff]   ;;  %v4151_v30 = vld [vmem:[#allocation2 + $0xe0] ss:$16 sps:$4 sm:$0xff]   ;;  %v4152_v31 = vld [vmem:[#allocation2 + $0xe8] ss:$16 sps:$4 sm:$0xff]  }
  0x55   :  { %902 = vmatprep.subr.bf16.mxu0 %v4123_v12  ;;  %984 = vmatprep.subr.bf16.mxu1 %v4125_v13  ;;  %v4153_v32 = vld [vmem:[#allocation2 + $0x104] ss:$16 sps:$4 sm:$0xff]   ;;  %v4155_v33 = vld [vmem:[#allocation2 + $0x10c] ss:$16 sps:$4 sm:$0xff]   ;;  %v4157_v34 = vld [vmem:[#allocation2 + $0x100] ss:$16 sps:$4 sm:$0xff]  }
  0x56   :  { %v4158_v35 = vld [vmem:[#allocation2 + $0x108] ss:$16 sps:$4 sm:$0xff]   ;;  %v4159_v36 = vld [vmem:[#allocation2 + $0x124] ss:$16 sps:$4 sm:$0xff]   ;;  %v4161_v37 = vld [vmem:[#allocation2 + $0x12c] ss:$16 sps:$4 sm:$0xff]  }
  0x57   :  { %v4163_v38 = vld [vmem:[#allocation2 + $0x120] ss:$16 sps:$4 sm:$0xff]   ;;  %v4164_v39 = vld [vmem:[#allocation2 + $0x128] ss:$16 sps:$4 sm:$0xff]   ;;  %v4165_v40 = vld [vmem:[#allocation2 + $0x144] ss:$16 sps:$4 sm:$0xff]  }
  0x58   :  { %903 = vmatpush1.bf16.msra.mxu0 %v4127_v14  ;;  %985 = vmatpush1.bf16.msra.mxu1 %v4128_v15  ;;  %v4167_v41 = vld [vmem:[#allocation2 + $0x14c] ss:$16 sps:$4 sm:$0xff]   ;;  %v4169_v42 = vld [vmem:[#allocation2 + $0x140] ss:$16 sps:$4 sm:$0xff]   ;;  %v4170_v43 = vld [vmem:[#allocation2 + $0x148] ss:$16 sps:$4 sm:$0xff]  }
  0x59   :  { %904 = vmatprep.subr.bf16.mxu0 %v4129_v16  ;;  %986 = vmatprep.subr.bf16.mxu1 %v4131_v17  ;;  %v4171_v44 = vld [vmem:[#allocation2 + $0x164] ss:$16 sps:$4 sm:$0xff]   ;;  %v4173_v45 = vld [vmem:[#allocation2 + $0x16c] ss:$16 sps:$4 sm:$0xff]   ;;  %v4175_v47 = vld [vmem:[#allocation2 + $0x160] ss:$16 sps:$4 sm:$0xff]  }
  0x5a   :  { %v90_v46 = vld [vmem:[%s5063_s0] sm:$0xff]  ;;  %v4176_v49 = vld [vmem:[#allocation2 + $0x168] ss:$16 sps:$4 sm:$0xff]   ;;  %v4179_v51 = vld [vmem:[#allocation2 + $0x18c] ss:$16 sps:$4 sm:$0xff]  }
  0x5b   :  { %v3549_v48 = vcombine.high %v90_v46, %v90_v46  ;;  %v4177_v50 = vld [vmem:[#allocation2 + $0x184] ss:$16 sps:$4 sm:$0xff]   ;;  %v4181_v52 = vld [vmem:[#allocation2 + $0x180] ss:$16 sps:$4 sm:$0xff]   ;;  %v4182_v53 = vld [vmem:[#allocation2 + $0x188] ss:$16 sps:$4 sm:$0xff]   ;;  %v3548_v4 = vcombine.low %v90_v46, %v90_v46 }
  0x5c   :  { %905 = vmatpush1.bf16.msra.mxu0 %v4133_v18  ;;  %987 = vmatpush1.bf16.msra.mxu1 %v4134_v19  ;;  %v4183_v54 = vld [vmem:[#allocation2 + $0x1a4] ss:$16 sps:$4 sm:$0xff]   ;;  %v4185_v55 = vld [vmem:[#allocation2 + $0x1ac] ss:$16 sps:$4 sm:$0xff]   ;;  %v4187_v56 = vld [vmem:[#allocation2 + $0x1a0] ss:$16 sps:$4 sm:$0xff]  }
  0x5d   :  { %906 = vmatprep.subr.bf16.mxu0 %v4135_v20  ;;  %988 = vmatprep.subr.bf16.mxu1 %v4137_v21  ;;  %v4188_v57 = vld [vmem:[#allocation2 + $0x1a8] ss:$16 sps:$4 sm:$0xff]   ;;  %v4189_v58 = vld [vmem:[#allocation2 + $0x1c4] ss:$16 sps:$4 sm:$0xff]   ;;  %v4191_v59 = vld [vmem:[#allocation2 + $0x1cc] ss:$16 sps:$4 sm:$0xff]  }
  0x5e   :  { %928 = vmatprep.mubr.bf16.mxu0 %v3549_v48  ;;  %1010 = vmatprep.mubr.bf16.mxu1 %v3549_v48  ;;  %v4193_v60 = vld [vmem:[#allocation2 + $0x1c0] ss:$16 sps:$4 sm:$0xff]   ;;  %v4194_v61 = vld [vmem:[#allocation2 + $0x1c8] ss:$16 sps:$4 sm:$0xff]   ;;  %v4195_v62 = vld [vmem:[#allocation2 + $0x1e4] ss:$16 sps:$4 sm:$0xff]  }
  0x5f   :  { %v4197_v63 = vld [vmem:[#allocation2 + $0x1ec] ss:$16 sps:$4 sm:$0xff]   ;;  %v4199_v0 = vld [vmem:[#allocation2 + $0x1e0] ss:$16 sps:$4 sm:$0xff]   ;;  %v4200_v1 = vld [vmem:[#allocation2 + $0x1e8] ss:$16 sps:$4 sm:$0xff]  }
  0x60   :  { %907 = vmatpush1.bf16.msra.mxu0 %v4139_v22  ;;  %989 = vmatpush1.bf16.msra.mxu1 %v4140_v23  ;;  %v4205_v2 = vld [vmem:[#allocation2 + $0x204] ss:$16 sps:$4 sm:$0xff]   ;;  %v4208_v3 = vld [vmem:[#allocation2 + $0x20c] ss:$16 sps:$4 sm:$0xff]   ;;  %v4203_v5 = vld [vmem:[#allocation2 + $0x200] ss:$16 sps:$4 sm:$0xff]  }
  0x61   :  { %908 = vmatprep.subr.bf16.mxu0 %v4141_v24  ;;  %990 = vmatprep.subr.bf16.mxu1 %v4143_v25  ;;  %v4206_v6 = vld [vmem:[#allocation2 + $0x208] ss:$16 sps:$4 sm:$0xff]   ;;  %v4211_v7 = vld [vmem:[#allocation2 + $0x224] ss:$16 sps:$4 sm:$0xff]   ;;  %v4214_v8 = vld [vmem:[#allocation2 + $0x22c] ss:$16 sps:$4 sm:$0xff]  }
  0x62   :  { %v4209_v9 = vld [vmem:[#allocation2 + $0x220] ss:$16 sps:$4 sm:$0xff]   ;;  %v4212_v10 = vld [vmem:[#allocation2 + $0x228] ss:$16 sps:$4 sm:$0xff]   ;;  %v4217_v11 = vld [vmem:[#allocation2 + $0x244] ss:$16 sps:$4 sm:$0xff]  }
  0x63   :  { %v4220_v12 = vld [vmem:[#allocation2 + $0x24c] ss:$16 sps:$4 sm:$0xff]   ;;  %v4215_v13 = vld [vmem:[#allocation2 + $0x240] ss:$16 sps:$4 sm:$0xff]   ;;  %v4218_v14 = vld [vmem:[#allocation2 + $0x248] ss:$16 sps:$4 sm:$0xff]  }
  0x64   :  { %909 = vmatpush1.bf16.msra.mxu0 %v4145_v26  ;;  %991 = vmatpush1.bf16.msra.mxu1 %v4146_v27  ;;  %v4223_v15 = vld [vmem:[#allocation2 + $0x264] ss:$16 sps:$4 sm:$0xff]   ;;  %v4226_v16 = vld [vmem:[#allocation2 + $0x26c] ss:$16 sps:$4 sm:$0xff]   ;;  %v4221_v17 = vld [vmem:[#allocation2 + $0x260] ss:$16 sps:$4 sm:$0xff]  }
  0x65   :  { %910 = vmatprep.subr.bf16.mxu0 %v4147_v28  ;;  %992 = vmatprep.subr.bf16.mxu1 %v4149_v29  ;;  %v4224_v18 = vld [vmem:[#allocation2 + $0x268] ss:$16 sps:$4 sm:$0xff]   ;;  %v4229_v19 = vld [vmem:[#allocation2 + $0x284] ss:$16 sps:$4 sm:$0xff]   ;;  %v4232_v20 = vld [vmem:[#allocation2 + $0x28c] ss:$16 sps:$4 sm:$0xff]  }
  0x66   :  { %v4227_v21 = vld [vmem:[#allocation2 + $0x280] ss:$16 sps:$4 sm:$0xff]   ;;  %v4230_v22 = vld [vmem:[#allocation2 + $0x288] ss:$16 sps:$4 sm:$0xff]   ;;  %v4235_v23 = vld [vmem:[#allocation2 + $0x2a4] ss:$16 sps:$4 sm:$0xff]  }
  0x67   :  { %v4238_v24 = vld [vmem:[#allocation2 + $0x2ac] ss:$16 sps:$4 sm:$0xff]   ;;  %v4233_v25 = vld [vmem:[#allocation2 + $0x2a0] ss:$16 sps:$4 sm:$0xff]   ;;  %v4236_v26 = vld [vmem:[#allocation2 + $0x2a8] ss:$16 sps:$4 sm:$0xff]  }
  0x68   :  { %911 = vmatpush1.bf16.msra.mxu0 %v4151_v30  ;;  %993 = vmatpush1.bf16.msra.mxu1 %v4152_v31  ;;  %v4241_v27 = vld [vmem:[#allocation2 + $0x2c4] ss:$16 sps:$4 sm:$0xff]   ;;  %v4244_v28 = vld [vmem:[#allocation2 + $0x2cc] ss:$16 sps:$4 sm:$0xff]   ;;  %v4239_v30 = vld [vmem:[#allocation2 + $0x2c0] ss:$16 sps:$4 sm:$0xff]  }
  0x69   :  { %912 = vmatprep.subr.bf16.mxu0 %v4153_v32  ;;  %994 = vmatprep.subr.bf16.mxu1 %v4155_v33  ;;  %v4950_v29 = vld [vmem:[%s5063_s0 + $0x8] sm:$0xff]  ;;  %v4247_v33 = vld [vmem:[#allocation2 + $0x2e4] ss:$16 sps:$4 sm:$0xff]  }
  0x6a   :  { %v3551_v31 = vcombine.high %v4950_v29, %v4950_v29  ;;  %v4242_v32 = vld [vmem:[#allocation2 + $0x2c8] ss:$16 sps:$4 sm:$0xff]   ;;  %v4268_v46 = vld [vmem:[#allocation2 + $0x34c] ss:$16 sps:$4 sm:$0xff]  }
  0x6b   :  { %v4266_v48 = vld [vmem:[#allocation2 + $0x348] ss:$16 sps:$4 sm:$0xff]  }
  0x6c   :  { %913 = vmatpush1.bf16.msra.mxu0 %v4157_v34  ;;  %995 = vmatpush1.bf16.msra.mxu1 %v4158_v35  ;;  %v4250_v34 = vld [vmem:[#allocation2 + $0x2ec] ss:$16 sps:$4 sm:$0xff]   ;;  %v4245_v35 = vld [vmem:[#allocation2 + $0x2e0] ss:$16 sps:$4 sm:$0xff]  }
  0x6d   :  { %914 = vmatprep.subr.bf16.mxu0 %v4159_v36  ;;  %996 = vmatprep.subr.bf16.mxu1 %v4161_v37  ;;  %v4248_v36 = vld [vmem:[#allocation2 + $0x2e8] ss:$16 sps:$4 sm:$0xff]   ;;  %v4253_v37 = vld [vmem:[#allocation2 + $0x304] ss:$16 sps:$4 sm:$0xff]  }
  0x70   :  { %915 = vmatpush1.bf16.msra.mxu0 %v4163_v38  ;;  %997 = vmatpush1.bf16.msra.mxu1 %v4164_v39  ;;  %v4256_v38 = vld [vmem:[#allocation2 + $0x30c] ss:$16 sps:$4 sm:$0xff]   ;;  %v4251_v39 = vld [vmem:[#allocation2 + $0x300] ss:$16 sps:$4 sm:$0xff]  }
  0x71   :  { %916 = vmatprep.subr.bf16.mxu0 %v4165_v40  ;;  %998 = vmatprep.subr.bf16.mxu1 %v4167_v41  ;;  %v4254_v40 = vld [vmem:[#allocation2 + $0x308] ss:$16 sps:$4 sm:$0xff]   ;;  %v4259_v41 = vld [vmem:[#allocation2 + $0x324] ss:$16 sps:$4 sm:$0xff]  }
  0x74   :  { %917 = vmatpush1.bf16.msra.mxu0 %v4169_v42  ;;  %999 = vmatpush1.bf16.msra.mxu1 %v4170_v43  ;;  %v4262_v42 = vld [vmem:[#allocation2 + $0x32c] ss:$16 sps:$4 sm:$0xff]   ;;  %v4257_v43 = vld [vmem:[#allocation2 + $0x320] ss:$16 sps:$4 sm:$0xff]  }
  0x75   :  { %918 = vmatprep.subr.bf16.mxu0 %v4171_v44  ;;  %1000 = vmatprep.subr.bf16.mxu1 %v4173_v45  ;;  %v4260_v44 = vld [vmem:[#allocation2 + $0x328] ss:$16 sps:$4 sm:$0xff]   ;;  %v4265_v45 = vld [vmem:[#allocation2 + $0x344] ss:$16 sps:$4 sm:$0xff]  }
  0x78   :  { %919 = vmatpush1.bf16.msra.mxu0 %v4175_v47  ;;  %1001 = vmatpush1.bf16.msra.mxu1 %v4176_v49  ;;  %v4263_v47 = vld [vmem:[#allocation2 + $0x340] ss:$16 sps:$4 sm:$0xff]   ;;  %v4271_v49 = vld [vmem:[#allocation2 + $0x364] ss:$16 sps:$4 sm:$0xff]  }
  0x79   :  { %920 = vmatprep.subr.bf16.mxu0 %v4177_v50  ;;  %1002 = vmatprep.subr.bf16.mxu1 %v4179_v51  ;;  %v4274_v50 = vld [vmem:[#allocation2 + $0x36c] ss:$16 sps:$4 sm:$0xff]   ;;  %v4269_v51 = vld [vmem:[#allocation2 + $0x360] ss:$16 sps:$4 sm:$0xff]  }
  0x7c   :  { %921 = vmatpush1.bf16.msra.mxu0 %v4181_v52  ;;  %1003 = vmatpush1.bf16.msra.mxu1 %v4182_v53  ;;  %v4272_v52 = vld [vmem:[#allocation2 + $0x368] ss:$16 sps:$4 sm:$0xff]   ;;  %v4277_v53 = vld [vmem:[#allocation2 + $0x384] ss:$16 sps:$4 sm:$0xff]  }
  0x7d   :  { %922 = vmatprep.subr.bf16.mxu0 %v4183_v54  ;;  %1004 = vmatprep.subr.bf16.mxu1 %v4185_v55  ;;  %v4280_v54 = vld [vmem:[#allocation2 + $0x38c] ss:$16 sps:$4 sm:$0xff]   ;;  %v4275_v55 = vld [vmem:[#allocation2 + $0x380] ss:$16 sps:$4 sm:$0xff]  }
  0x80   :  { %923 = vmatpush1.bf16.msra.mxu0 %v4187_v56  ;;  %1005 = vmatpush1.bf16.msra.mxu1 %v4188_v57  ;;  %v4278_v56 = vld [vmem:[#allocation2 + $0x388] ss:$16 sps:$4 sm:$0xff]   ;;  %v4283_v57 = vld [vmem:[#allocation2 + $0x3a4] ss:$16 sps:$4 sm:$0xff]  }
  0x81   :  { %924 = vmatprep.subr.bf16.mxu0 %v4189_v58  ;;  %1006 = vmatprep.subr.bf16.mxu1 %v4191_v59  ;;  %v4286_v58 = vld [vmem:[#allocation2 + $0x3ac] ss:$16 sps:$4 sm:$0xff]   ;;  %v4281_v59 = vld [vmem:[#allocation2 + $0x3a0] ss:$16 sps:$4 sm:$0xff]  }
  0x84   :  { %925 = vmatpush1.bf16.msra.mxu0 %v4193_v60  ;;  %1007 = vmatpush1.bf16.msra.mxu1 %v4194_v61  ;;  %v4284_v60 = vld [vmem:[#allocation2 + $0x3a8] ss:$16 sps:$4 sm:$0xff]   ;;  %v4289_v61 = vld [vmem:[#allocation2 + $0x3c4] ss:$16 sps:$4 sm:$0xff]  }
  0x85   :  { %926 = vmatprep.subr.bf16.mxu0 %v4195_v62  ;;  %1008 = vmatprep.subr.bf16.mxu1 %v4197_v63  ;;  %v4292_v62 = vld [vmem:[#allocation2 + $0x3cc] ss:$16 sps:$4 sm:$0xff]   ;;  %v4287_v63 = vld [vmem:[#allocation2 + $0x3c0] ss:$16 sps:$4 sm:$0xff]  }
  0x88   :  { %927 = vmatpush1.bf16.msra.mxu0 %v4199_v0  ;;  %1009 = vmatpush1.bf16.msra.mxu1 %v4200_v1  ;;  %v4290_v0 = vld [vmem:[#allocation2 + $0x3c8] ss:$16 sps:$4 sm:$0xff]   ;;  %v4295_v1 = vld [vmem:[#allocation2 + $0x3e4] ss:$16 sps:$4 sm:$0xff]  }
  0x89   :  { %937 = vmatprep.subr.bf16.mxu0 %v4205_v2  ;;  %1019 = vmatprep.subr.bf16.mxu1 %v4208_v3  ;;  %v4298_v2 = vld [vmem:[#allocation2 + $0x3ec] ss:$16 sps:$4 sm:$0xff]   ;;  %v4293_v3 = vld [vmem:[#allocation2 + $0x3e0] ss:$16 sps:$4 sm:$0xff]  }
  0x8b   :  { %929 = vmatmul.mubr.bf16.vlgmr.msra.gmra.mrb[0].mxu0 %v3548_v4  ;;  %1011 = vmatmul.mubr.bf16.vlgmr.msra.gmra.mrb[0].mxu1 %v3548_v4  ;;  %v4296_v4 = vld [vmem:[#allocation2 + $0x3e8] ss:$16 sps:$4 sm:$0xff]  }
  0x8c   :  { %938 = vmatpush1.bf16.msra.mxu0 %v4203_v5  ;;  %1020 = vmatpush1.bf16.msra.mxu1 %v4206_v6  ;;  %v4301_v5 = vld [vmem:[#allocation4 + $0x40] sm:$0xff]  }
  0x8d   :  { %939 = vmatprep.subr.bf16.mxu0 %v4211_v7  ;;  %1021 = vmatprep.subr.bf16.mxu1 %v4214_v8  ;;  %v4302_v6 = vld [vmem:[#allocation4] sm:$0xff]   ;;  %v3550_v7 = vcombine.low %v4950_v29, %v4950_v29  ;;  %v4303_v8 = vld [vmem:[#allocation4 + $0x48] sm:$0xff]  }
  0x8e   :  { %969 = vmatprep.mubr.bf16.mxu0 %v3551_v31  ;;  %1051 = vmatprep.mubr.bf16.mxu1 %v3551_v31 }
  0x90   :  { %940 = vmatpush1.bf16.msra.mxu0 %v4209_v9  ;;  %1022 = vmatpush1.bf16.msra.mxu1 %v4212_v10  ;;  %v4304_v9 = vld [vmem:[#allocation4 + $0x8] sm:$0xff]   ;;  %v4305_v10 = vld [vmem:[#allocation4 + $0x50] sm:$0xff]  }
  0x91   :  { %941 = vmatprep.subr.bf16.mxu0 %v4217_v11  ;;  %1023 = vmatprep.subr.bf16.mxu1 %v4220_v12  ;;  %v4306_v11 = vld [vmem:[#allocation4 + $0x10] sm:$0xff]   ;;  %v4307_v12 = vld [vmem:[#allocation4 + $0x58] sm:$0xff]  }
  0x94   :  { %942 = vmatpush1.bf16.msra.mxu0 %v4215_v13  ;;  %1024 = vmatpush1.bf16.msra.mxu1 %v4218_v14  ;;  %v4308_v13 = vld [vmem:[#allocation4 + $0x18] sm:$0xff]   ;;  %v4309_v14 = vld [vmem:[#allocation4 + $0x60] sm:$0xff]  }
  0x95   :  { %943 = vmatprep.subr.bf16.mxu0 %v4223_v15  ;;  %1025 = vmatprep.subr.bf16.mxu1 %v4226_v16  ;;  %v4310_v15 = vld [vmem:[#allocation4 + $0x20] sm:$0xff]   ;;  %v4311_v16 = vld [vmem:[#allocation4 + $0x68] sm:$0xff]  }
  0x98   :  { %944 = vmatpush1.bf16.msra.mxu0 %v4221_v17  ;;  %1026 = vmatpush1.bf16.msra.mxu1 %v4224_v18  ;;  %v4312_v17 = vld [vmem:[#allocation4 + $0x28] sm:$0xff]   ;;  %v4313_v18 = vld [vmem:[#allocation4 + $0x70] sm:$0xff]  }
  0x99   :  { %945 = vmatprep.subr.bf16.mxu0 %v4229_v19  ;;  %1027 = vmatprep.subr.bf16.mxu1 %v4232_v20  ;;  %v4314_v19 = vld [vmem:[#allocation4 + $0x30] sm:$0xff]   ;;  %v4315_v20 = vld [vmem:[#allocation4 + $0x78] sm:$0xff]  }
  0x9c   :  { %946 = vmatpush1.bf16.msra.mxu0 %v4227_v21  ;;  %1028 = vmatpush1.bf16.msra.mxu1 %v4230_v22  ;;  %v4316_v21 = vld [vmem:[#allocation4 + $0x38] sm:$0xff]   ;;  %v4317_v22 = vld [vmem:[#allocation4 + $0xc0] sm:$0xff]  }
  0x9d   :  { %947 = vmatprep.subr.bf16.mxu0 %v4235_v23  ;;  %1029 = vmatprep.subr.bf16.mxu1 %v4238_v24  ;;  %v222_v23 = vlaneseq }
  0x9f   :  { %v4956_v24 = vshrl.u32 %v222_v23, 7  ;;  %v4357_v23 = vld [vmem:[#allocation6 + $0x80] ss:$16 sps:$4 sm:$0xff]  }
  0xa0   :  { %948 = vmatpush1.bf16.msra.mxu0 %v4233_v25  ;;  %1030 = vmatpush1.bf16.msra.mxu1 %v4236_v26  ;;  %v220_v26 = vld [vmem:[%s5065_s2] sm:$0xf] }
  0xa1   :  { %949 = vmatprep.subr.bf16.mxu0 %v4241_v27  ;;  %1031 = vmatprep.subr.bf16.mxu1 %v4244_v28  ;;  %v4959_v25 = vsub.s32 0, %v4956_v24  ;;  %v4965_v27 = vsub.s32 1, %v4956_v24  ;;  %v4968_v28 = vsub.s32 3, %v4956_v24 }
  0xa3   :  { %v225_v29 = vrot.slane %v220_v26, %v4959_v25  ;;  %v237_v31 = vrot.slane %v220_v26, %v4968_v28 }
  0xa4   :  { %950 = vmatpush1.bf16.msra.mxu0 %v4239_v30  ;;  %1032 = vmatpush1.bf16.msra.mxu1 %v4242_v32  ;;  %v229_v30 = vrot.slane %v220_v26, %v4965_v27 }
  0xa5   :  { %951 = vmatprep.subr.bf16.mxu0 %v4247_v33  ;;  %1033 = vmatprep.subr.bf16.mxu1 %v4250_v34 }
  0xa8   :  { %952 = vmatpush1.bf16.msra.mxu0 %v4245_v35  ;;  %1034 = vmatpush1.bf16.msra.mxu1 %v4248_v36 }
  0xa9   :  { %953 = vmatprep.subr.bf16.mxu0 %v4253_v37  ;;  %1035 = vmatprep.subr.bf16.mxu1 %v4256_v38 }
  0xac   :  { %954 = vmatpush1.bf16.msra.mxu0 %v4251_v39  ;;  %1036 = vmatpush1.bf16.msra.mxu1 %v4254_v40 }
  0xad   :  { %955 = vmatprep.subr.bf16.mxu0 %v4259_v41  ;;  %1037 = vmatprep.subr.bf16.mxu1 %v4262_v42 }
  0xb0   :  { %956 = vmatpush1.bf16.msra.mxu0 %v4257_v43  ;;  %1038 = vmatpush1.bf16.msra.mxu1 %v4260_v44 }
  0xb1   :  { %957 = vmatprep.subr.bf16.mxu0 %v4265_v45  ;;  %1039 = vmatprep.subr.bf16.mxu1 %v4268_v46 }
  0xb4   :  { %958 = vmatpush1.bf16.msra.mxu0 %v4263_v47  ;;  %1040 = vmatpush1.bf16.msra.mxu1 %v4266_v48  ;;  %v4318_v47 = vld [vmem:[#allocation4 + $0x80] sm:$0xff]  }
  0xb5   :  { %959 = vmatprep.subr.bf16.mxu0 %v4271_v49  ;;  %1041 = vmatprep.subr.bf16.mxu1 %v4274_v50  ;;  %v4319_v49 = vld [vmem:[#allocation4 + $0xc8] sm:$0xff]  }
  0xb8   :  { %960 = vmatpush1.bf16.msra.mxu0 %v4269_v51  ;;  %1042 = vmatpush1.bf16.msra.mxu1 %v4272_v52  ;;  %v4320_v51 = vld [vmem:[#allocation4 + $0x88] sm:$0xff]   ;;  %v4321_v52 = vld [vmem:[#allocation4 + $0xd0] sm:$0xff]  }
  0xb9   :  { %961 = vmatprep.subr.bf16.mxu0 %v4277_v53  ;;  %1043 = vmatprep.subr.bf16.mxu1 %v4280_v54  ;;  %v4322_v53 = vld [vmem:[#allocation4 + $0x90] sm:$0xff]   ;;  %v4323_v54 = vld [vmem:[#allocation4 + $0xd8] sm:$0xff]  }
  0xbc   :  { %962 = vmatpush1.bf16.msra.mxu0 %v4275_v55  ;;  %1044 = vmatpush1.bf16.msra.mxu1 %v4278_v56  ;;  %v4324_v55 = vld [vmem:[#allocation4 + $0x98] sm:$0xff]   ;;  %v4325_v56 = vld [vmem:[#allocation4 + $0xe0] sm:$0xff]  }
  0xbd   :  { %963 = vmatprep.subr.bf16.mxu0 %v4283_v57  ;;  %1045 = vmatprep.subr.bf16.mxu1 %v4286_v58  ;;  %v4326_v57 = vld [vmem:[#allocation4 + $0xa0] sm:$0xff]   ;;  %v4974_v58 = vsub.s32 2, %v4956_v24 }
  0xc0   :  { %964 = vmatpush1.bf16.msra.mxu0 %v4281_v59  ;;  %1046 = vmatpush1.bf16.msra.mxu1 %v4284_v60  ;;  %v4327_v59 = vld [vmem:[#allocation4 + $0xe8] sm:$0xff]  }
  0xc1   :  { %965 = vmatprep.subr.bf16.mxu0 %v4289_v61  ;;  %1047 = vmatprep.subr.bf16.mxu1 %v4292_v62  ;;  %v4328_v60 = vld [vmem:[#allocation4 + $0xa8] sm:$0xff]   ;;  %v233_v61 = vrot.slane %v220_v26, %v4974_v58  ;;  %v4329_v62 = vld [vmem:[#allocation4 + $0xf0] sm:$0xff]  }
  0xc2   :  { %v4360_v26 = vld [vmem:[#allocation6 + $0x88] ss:$16 sps:$4 sm:$0xff]  }
  0xc4   :  { %966 = vmatpush1.bf16.msra.mxu0 %v4287_v63  ;;  %1048 = vmatpush1.bf16.msra.mxu1 %v4290_v0  ;;  %v4330_v63 = vld [vmem:[#allocation4 + $0xb0] sm:$0xff]  }
  0xc5   :  { %967 = vmatprep.subr.bf16.mxu0 %v4295_v1  ;;  %1049 = vmatprep.subr.bf16.mxu1 %v4298_v2  ;;  %v4331_v1 = vld [vmem:[#allocation4 + $0xf8] sm:$0xff]  }
  0xc6   :  { %v4332_v2 = vld [vmem:[#allocation4 + $0xb8] sm:$0xff]  }
  0xc8   :  { %968 = vmatpush1.bf16.msra.mxu0 %v4293_v3  ;;  %1050 = vmatpush1.bf16.msra.mxu1 %v4296_v4 }
  0xc9   :  { %3976 = vmatprep.subr.bf16.mxu1 %v4301_v5  ;;  %v4333_v5 = vld [vmem:[#allocation6] ss:$16 sps:$4 sm:$0xff]  }
  0xcb   :  { %970 = vmatmul.mubr.bf16.vlgmr.msra.gmra.mrb[0].mxu0 %v3550_v7  ;;  %1052 = vmatmul.mubr.bf16.vlgmr.msra.gmra.mrb[0].mxu1 %v3550_v7  ;;  %v4336_v7 = vld [vmem:[#allocation6 + $0x8] ss:$16 sps:$4 sm:$0xff]  }
  0xcc   :  { %3977 = vmatpush3.bf16.msra.mxu1 %v4302_v6  ;;  %v4335_v6 = vld [vmem:[#allocation6 + $0x4] ss:$16 sps:$4 sm:$0xff]  }
  0xcd   :  { %3978 = vmatprep.subr.bf16.mxu1 %v4303_v8  ;;  %v4338_v8 = vld [vmem:[#allocation6 + $0xc] ss:$16 sps:$4 sm:$0xff]   ;;  %1626 = vmatprep.subr.bf16.mxu0 %v4335_v6  ;;  %v4404_v6 = vld [vmem:[#allocation7 + $0xb4] ss:$28 sps:$4 sm:$0xff]  }
  0xce   :  { %1627 = vmatpush1.bf16.msra.mxu0 %v4333_v5  ;;  %v4401_v5 = vld [vmem:[#allocation7 + $0xac] ss:$28 sps:$4 sm:$0xff]  }
  0xd0   :  { %3979 = vmatpush3.bf16.msra.mxu1 %v4304_v9  ;;  %v4341_v9 = vld [vmem:[#allocation6 + $0x24] ss:$16 sps:$4 sm:$0xff]  }
  0xd1   :  { %3980 = vmatprep.subr.bf16.mxu1 %v4305_v10  ;;  %v4344_v10 = vld [vmem:[#allocation6 + $0x2c] ss:$16 sps:$4 sm:$0xff]   ;;  %1628 = vmatprep.subr.bf16.mxu0 %v4341_v9  ;;  %v4407_v9 = vld [vmem:[#allocation7 + $0xe4] ss:$28 sps:$4 sm:$0xff]  }
  0xd4   :  { %3981 = vmatpush3.bf16.msra.mxu1 %v4306_v11  ;;  %v4339_v11 = vld [vmem:[#allocation6 + $0x20] ss:$16 sps:$4 sm:$0xff]  }
  0xd5   :  { %3982 = vmatprep.subr.bf16.mxu1 %v4307_v12  ;;  %v4342_v12 = vld [vmem:[#allocation6 + $0x28] ss:$16 sps:$4 sm:$0xff]   ;;  %1629 = vmatpush1.bf16.msra.mxu0 %v4339_v11  ;;  %v4405_v11 = vld [vmem:[#allocation7 + $0xe0] ss:$28 sps:$4 sm:$0xff]  }
  0xd8   :  { %3983 = vmatpush3.bf16.msra.mxu1 %v4308_v13  ;;  %v4347_v13 = vld [vmem:[#allocation6 + $0x44] ss:$16 sps:$4 sm:$0xff]  }
  0xd9   :  { %3984 = vmatprep.subr.bf16.mxu1 %v4309_v14  ;;  %v4350_v14 = vld [vmem:[#allocation6 + $0x4c] ss:$16 sps:$4 sm:$0xff]   ;;  %1630 = vmatprep.subr.bf16.mxu0 %v4347_v13 }
  0xda   :  { %v4413_v13 = vld [vmem:[#allocation7 + $0x11c] ss:$28 sps:$4 sm:$0xff]  }
  0xdc   :  { %3985 = vmatpush3.bf16.msra.mxu1 %v4310_v15  ;;  %v4345_v15 = vld [vmem:[#allocation6 + $0x40] ss:$16 sps:$4 sm:$0xff]  }
  0xdd   :  { %3986 = vmatprep.subr.bf16.mxu1 %v4311_v16  ;;  %v4348_v16 = vld [vmem:[#allocation6 + $0x48] ss:$16 sps:$4 sm:$0xff]   ;;  %1631 = vmatpush1.bf16.msra.mxu0 %v4345_v15 }
  0xde   :  { %v4411_v15 = vld [vmem:[#allocation7 + $0x118] ss:$28 sps:$4 sm:$0xff]  }
  0xe0   :  { %3987 = vmatpush3.bf16.msra.mxu1 %v4312_v17  ;;  %v4353_v17 = vld [vmem:[#allocation6 + $0x64] ss:$16 sps:$4 sm:$0xff]  }
  0xe1   :  { %3988 = vmatprep.subr.bf16.mxu1 %v4313_v18  ;;  %v4356_v18 = vld [vmem:[#allocation6 + $0x6c] ss:$16 sps:$4 sm:$0xff]   ;;  %1632 = vmatprep.subr.bf16.mxu0 %v4353_v17  ;;  %v4419_v17 = vld [vmem:[#allocation7 + $0x154] ss:$28 sps:$4 sm:$0xff]  }
  0xe4   :  { %3989 = vmatpush3.bf16.msra.mxu1 %v4314_v19  ;;  %v4351_v19 = vld [vmem:[#allocation6 + $0x60] ss:$16 sps:$4 sm:$0xff]  }
  0xe5   :  { %3990 = vmatprep.subr.bf16.mxu1 %v4315_v20  ;;  %v4354_v20 = vld [vmem:[#allocation6 + $0x68] ss:$16 sps:$4 sm:$0xff]   ;;  %1633 = vmatpush1.bf16.msra.mxu0 %v4351_v19  ;;  %v4417_v19 = vld [vmem:[#allocation7 + $0x150] ss:$28 sps:$4 sm:$0xff]  }
  0xe8   :  { %3991 = vmatpush3.bf16.msra.mxu1 %v4316_v21  ;;  %v4359_v21 = vld [vmem:[#allocation6 + $0x84] ss:$16 sps:$4 sm:$0xff]  }
  0xe9   :  { %3998 = vmatprep.subr.bf16.mxu1 %v4317_v22  ;;  %v4362_v22 = vld [vmem:[#allocation6 + $0x8c] ss:$16 sps:$4 sm:$0xff]   ;;  %1634 = vmatprep.subr.bf16.mxu0 %v4359_v21 }
  0xea   :  { %1635 = vmatpush1.bf16.msra.mxu0 %v4357_v23  ;;  %v4425_v21 = vld [vmem:[#allocation7 + $0x18c] ss:$28 sps:$4 sm:$0xff]  }
  0xeb   :  { %v4423_v23 = vld [vmem:[#allocation7 + $0x188] ss:$28 sps:$4 sm:$0xff]  }
 0x19e   :  { %v971_v32 = vpop.f32.mrb[0].mxu0  ;;  %v1053_v33 = vpop.f32.mrb[0].mxu1 }
 0x19f   :  { %v4064_v34 = vadd.f32 %v971_v32, %v225_v29  ;;  %v973_v35 = vpop.f32.mrb[1].mxu0  ;;  %v1055_v36 = vpop.f32.mrb[1].mxu1  ;;  %v4066_v0 = vadd.f32 %v1053_v33, %v233_v61  ;;  %v4365_v29 = vld [vmem:[#allocation6 + $0xa4] ss:$16 sps:$4 sm:$0xff]   ;;  %v4366_v32 = vld [vmem:[#allocation6 + $0xa8] ss:$16 sps:$4 sm:$0xff]  }
 0x1a0   :  { %v4065_v37 = vadd.f32 %v973_v35, %v229_v30  ;;  %v4067_v38 = vadd.f32 %v1055_v36, %v237_v31  ;;  %v975_v39 = vpop.f32.mrb[2].mxu0  ;;  %v1057_v40 = vpop.f32.mrb[2].mxu1  ;;  %v4368_v30 = vld [vmem:[#allocation6 + $0xac] ss:$16 sps:$4 sm:$0xff]   ;;  %v4363_v31 = vld [vmem:[#allocation6 + $0xa0] ss:$16 sps:$4 sm:$0xff]   ;;  %1636 = vmatprep.subr.bf16.mxu0 %v4365_v29 }
 0x1a1   :  { %v1060_v41 = vmax.f32 %v4064_v34, 0.0  ;;  %v976_v42 = vpop.f32.mrb[3].mxu0  ;;  %v1058_v43 = vpop.f32.mrb[3].mxu1  ;;  %v1062_v3 = vmax.f32 %v4066_v0, 0.0  ;;  %1637 = vmatpush1.bf16.msra.mxu0 %v4363_v31  ;;  %v4371_v33 = vld [vmem:[#allocation6 + $0xc4] ss:$16 sps:$4 sm:$0xff]  }
 0x1a2   :  { %v1061_v44 = vmax.f32 %v4065_v37, 0.0  ;;  %v1063_v45 = vmax.f32 %v4067_v38, 0.0  ;;  %v4374_v34 = vld [vmem:[#allocation6 + $0xcc] ss:$16 sps:$4 sm:$0xff]   ;;  %v4369_v35 = vld [vmem:[#allocation6 + $0xc0] ss:$16 sps:$4 sm:$0xff]   ;;  %1638 = vmatprep.subr.bf16.mxu0 %v4371_v33 }
 0x1a3   :  { %v1064_v48 = vpack.c.bf16 %v1060_v41, %v1060_v41  ;;  %v1066_v4 = vpack.c.bf16 %v1062_v3, %v1062_v3  ;;  %v4372_v36 = vld [vmem:[#allocation6 + $0xc8] ss:$16 sps:$4 sm:$0xff]   ;;  %v4377_v37 = vld [vmem:[#allocation6 + $0xe4] ss:$16 sps:$4 sm:$0xff]   ;;  %v4380_v38 = vld [vmem:[#allocation6 + $0xec] ss:$16 sps:$4 sm:$0xff]  }
 0x1a4   :  { %v1065_v46 = vpack.c.bf16 %v1061_v44, %v1061_v44  ;;  %v1067_v50 = vpack.c.bf16 %v1063_v45, %v1063_v45  ;;  %v4375_v39 = vld [vmem:[#allocation6 + $0xe0] ss:$16 sps:$4 sm:$0xff]   ;;  %v4378_v40 = vld [vmem:[#allocation6 + $0xe8] ss:$16 sps:$4 sm:$0xff]   ;;  %v4833_v41 = vmov 0  }
 0x1a5   :  { %1639 = vmatpush1.bf16.msra.mxu0 %v4369_v35  ;;  %1658 = vmatprep.mubr.bf16.mxu0 %v4833_v41  ;;  %v4383_v42 = vld [vmem:[#allocation7 + $0x4] ss:$28 sps:$4 sm:$0xff]   ;;  %v4386_v43 = vld [vmem:[#allocation7 + $0xc] ss:$28 sps:$4 sm:$0xff]   ;;  %v4389_v61 = vld [vmem:[#allocation7 + $0x3c] ss:$28 sps:$4 sm:$0xff]  }
 0x1a6   :  { %1363 = vmatprep.mubr.bf16.mxu1 %v1065_v46  ;;  %1640 = vmatprep.subr.bf16.mxu0 %v4377_v37  ;;  %v4390_v0 = vld [vmem:[#allocation7 + $0x40] ss:$28 sps:$4 sm:$0xff]   ;;  %v4393_v3 = vld [vmem:[#allocation7 + $0x70] ss:$28 sps:$4 sm:$0xff]   ;;  %v4435_v35 = vld [vmem:[#allocation7 + $0x1f8] ss:$28 sps:$4 sm:$0xff]  }
 0x1a7   :  { %1364 = vmatmul.mubr.bf16.vlgmr.msra.gmra.mrb[4].mxu1 %v1064_v48  ;;  %v4431_v29 = vld [vmem:[#allocation7 + $0x1c4] ss:$28 sps:$4 sm:$0xff]   ;;  %v4437_v33 = vld [vmem:[#allocation7 + $0x1fc] ss:$28 sps:$4 sm:$0xff]   ;;  %v4443_v37 = vld [vmem:[#allocation7 + $0x234] ss:$28 sps:$4 sm:$0xff]  }
 0x1a8   :  { %3999 = vmatpush3.bf16.msra.mxu1 %v4318_v47  ;;  %1403 = vmatprep.mubr.bf16.mxu1 %v1067_v50  ;;  %v4429_v31 = vld [vmem:[#allocation7 + $0x1c0] ss:$28 sps:$4 sm:$0xff]  }
 0x1a9   :  { %4000 = vmatprep.subr.bf16.mxu1 %v4319_v49  ;;  %1641 = vmatpush1.bf16.msra.mxu0 %v4375_v39  ;;  %v3680_v49 = vld [vmem:[%s5067_s4] ss:$0 sm:$0xff]  ;;  %v4441_v39 = vld [vmem:[#allocation7 + $0x230] ss:$28 sps:$4 sm:$0xff]  }
 0x1aa   :  { %3161 = vmatprep.subr.bf16.mxu0 %v4383_v42  ;;  %v4452_v42 = vld [vmem:[#allocation7 + $0x274] ss:$28 sps:$4 sm:$0xff]  }
 0x1ac   :  { %4001 = vmatpush3.bf16.msra.mxu1 %v4320_v51 }
 0x1ad   :  { %4002 = vmatprep.subr.bf16.mxu1 %v4321_v52 }
 0x1b0   :  { %4003 = vmatpush3.bf16.msra.mxu1 %v4322_v53 }
 0x1b1   :  { %4004 = vmatprep.subr.bf16.mxu1 %v4323_v54 }
 0x1b4   :  { %4005 = vmatpush3.bf16.msra.mxu1 %v4324_v55 }
 0x1b5   :  { %4006 = vmatprep.subr.bf16.mxu1 %v4325_v56 }
 0x1b8   :  { %4007 = vmatpush3.bf16.msra.mxu1 %v4326_v57  ;;  %v4381_v57 = vld [vmem:[#allocation7] ss:$28 sps:$4 sm:$0xff]  }
 0x1b9   :  { %4008 = vmatprep.subr.bf16.mxu1 %v4327_v59  ;;  %v4384_v59 = vld [vmem:[#allocation7 + $0x8] ss:$28 sps:$4 sm:$0xff]  }
 0x1bc   :  { %4009 = vmatpush3.bf16.msra.mxu1 %v4328_v60 }
 0x1bd   :  { %4010 = vmatprep.subr.bf16.mxu1 %v4329_v62  ;;  %v4392_v62 = vld [vmem:[#allocation7 + $0x44] ss:$28 sps:$4 sm:$0xff]  }
 0x1c0   :  { %4011 = vmatpush3.bf16.msra.mxu1 %v4330_v63  ;;  %v4387_v63 = vld [vmem:[#allocation7 + $0x38] ss:$28 sps:$4 sm:$0xff]  }
 0x1c1   :  { %4012 = vmatprep.subr.bf16.mxu1 %v4331_v1  ;;  %v4395_v1 = vld [vmem:[#allocation7 + $0x74] ss:$28 sps:$4 sm:$0xff]  }
 0x1c4   :  { %4013 = vmatpush3.bf16.msra.mxu1 %v4332_v2  ;;  %v4398_v2 = vld [vmem:[#allocation7 + $0x7c] ss:$28 sps:$4 sm:$0xff]  }
 0x1c5   :  { %1667 = vmatprep.subr.bf16.mxu1 %v4338_v8  ;;  %v4402_v8 = vld [vmem:[#allocation7 + $0xb0] ss:$28 sps:$4 sm:$0xff]  }
 0x1c7   :  { %1404 = vmatmul.mubr.bf16.vlgmr.msra.gmra.mrb[8].mxu1 %v1066_v4  ;;  %v4396_v4 = vld [vmem:[#allocation7 + $0x78] ss:$28 sps:$4 sm:$0xff]  }
 0x1c8   :  { %1668 = vmatpush1.bf16.msra.mxu1 %v4336_v7  ;;  %1699 = vmatprep.mubr.bf16.mxu1 %v4833_v41  ;;  %v4399_v7 = vld [vmem:[#allocation7 + $0xa8] ss:$28 sps:$4 sm:$0xff]  }
 0x1c9   :  { %1669 = vmatprep.subr.bf16.mxu1 %v4344_v10  ;;  %v4410_v10 = vld [vmem:[#allocation7 + $0xec] ss:$28 sps:$4 sm:$0xff]  }
 0x1ca   :  { %v4449_v41 = vld [vmem:[#allocation7 + $0x26c] ss:$28 sps:$4 sm:$0xff]  }
 0x1cc   :  { %1670 = vmatpush1.bf16.msra.mxu1 %v4342_v12  ;;  %v4408_v12 = vld [vmem:[#allocation7 + $0xe8] ss:$28 sps:$4 sm:$0xff]  }
 0x1cd   :  { %1671 = vmatprep.subr.bf16.mxu1 %v4350_v14  ;;  %v4416_v14 = vld [vmem:[#allocation7 + $0x124] ss:$28 sps:$4 sm:$0xff]  }
 0x1d0   :  { %1672 = vmatpush1.bf16.msra.mxu1 %v4348_v16  ;;  %v4414_v16 = vld [vmem:[#allocation7 + $0x120] ss:$28 sps:$4 sm:$0xff]  }
 0x1d1   :  { %1673 = vmatprep.subr.bf16.mxu1 %v4356_v18  ;;  %v4422_v18 = vld [vmem:[#allocation7 + $0x15c] ss:$28 sps:$4 sm:$0xff]  }
 0x1d4   :  { %1674 = vmatpush1.bf16.msra.mxu1 %v4354_v20  ;;  %v4420_v20 = vld [vmem:[#allocation7 + $0x158] ss:$28 sps:$4 sm:$0xff]  }
 0x1d5   :  { %1675 = vmatprep.subr.bf16.mxu1 %v4362_v22  ;;  %v4428_v22 = vld [vmem:[#allocation7 + $0x194] ss:$28 sps:$4 sm:$0xff]  }
 0x1d8   :  { %1676 = vmatpush1.bf16.msra.mxu1 %v4360_v26  ;;  %v4426_v26 = vld [vmem:[#allocation7 + $0x190] ss:$28 sps:$4 sm:$0xff]  }
 0x1d9   :  { %1677 = vmatprep.subr.bf16.mxu1 %v4368_v30  ;;  %v4434_v30 = vld [vmem:[#allocation7 + $0x1cc] ss:$28 sps:$4 sm:$0xff]  }
 0x1dc   :  { %1678 = vmatpush1.bf16.msra.mxu1 %v4366_v32  ;;  %v4432_v32 = vld [vmem:[#allocation7 + $0x1c8] ss:$28 sps:$4 sm:$0xff]  }
 0x1dd   :  { %1679 = vmatprep.subr.bf16.mxu1 %v4374_v34  ;;  %v4440_v34 = vld [vmem:[#allocation7 + $0x204] ss:$28 sps:$4 sm:$0xff]  }
 0x1e0   :  { %1680 = vmatpush1.bf16.msra.mxu1 %v4372_v36  ;;  %v4438_v36 = vld [vmem:[#allocation7 + $0x200] ss:$28 sps:$4 sm:$0xff]  }
 0x1e1   :  { %1681 = vmatprep.subr.bf16.mxu1 %v4380_v38  ;;  %v4446_v38 = vld [vmem:[#allocation7 + $0x23c] ss:$28 sps:$4 sm:$0xff]  }
 0x1e4   :  { %1682 = vmatpush1.bf16.msra.mxu1 %v4378_v40  ;;  %v4444_v40 = vld [vmem:[#allocation7 + $0x238] ss:$28 sps:$4 sm:$0xff]  }
 0x1e5   :  { %3243 = vmatprep.subr.bf16.mxu1 %v4386_v43  ;;  %v4447_v43 = vld [vmem:[#allocation7 + $0x268] ss:$28 sps:$4 sm:$0xff]  }
 0x27a   :  { %v3992_v44 = vpop.f32.mrb[4].mxu1 }
 0x27b   :  { %v3993_v45 = vpop.f32.mrb[5].mxu1 }
 0x27c   :  { %v3994_v46 = vadd.f32 %v3993_v45, %v3992_v44  ;;  %v3995_v47 = vpop.f32.mrb[6].mxu1  ;;  %v4450_v44 = vld [vmem:[#allocation7 + $0x270] ss:$28 sps:$4 sm:$0xff]   ;;  %v4455_v45 = vld [vmem:[#allocation7 + $0x2a4] ss:$28 sps:$4 sm:$0xff]  }
 0x27d   :  { %v3996_v48 = vpop.f32.mrb[7].mxu1  ;;  %v4453_v47 = vld [vmem:[#allocation7 + $0x2a0] ss:$28 sps:$4 sm:$0xff]  }
 0x27e   :  { %v1366_v52 = vadd.f32 %v3994_v46, %v3680_v49  ;;  %v4458_v46 = vld [vmem:[#allocation7 + $0x2ac] ss:$28 sps:$4 sm:$0xff]   ;;  %v4461_v49 = vld [vmem:[#allocation7 + $0x2dc] ss:$28 sps:$4 sm:$0xff]  }
 0x27f   :  { %v4456_v48 = vld [vmem:[#allocation7 + $0x2a8] ss:$28 sps:$4 sm:$0xff]  }
 0x29a   :  { %v4014_v50 = vpop.f32.mrb[8].mxu1 }
 0x29b   :  { %v4015_v51 = vpop.f32.mrb[9].mxu1 }
 0x29c   :  { %v4016_v53 = vadd.f32 %v4015_v51, %v4014_v50  ;;  %v4017_v54 = vpop.f32.mrb[10].mxu1  ;;  %v4464_v50 = vld [vmem:[#allocation7 + $0x2e4] ss:$28 sps:$4 sm:$0xff]   ;;  %v4459_v51 = vld [vmem:[#allocation7 + $0x2d8] ss:$28 sps:$4 sm:$0xff]  }
 0x29d   :  { %v4018_v55 = vpop.f32.mrb[11].mxu1  ;;  %v4470_v54 = vld [vmem:[#allocation7 + $0x31c] ss:$28 sps:$4 sm:$0xff]  }
 0x29e   :  { %v1406_v56 = vadd.f32 %v4016_v53, %v1366_v52  ;;  %v4462_v52 = vld [vmem:[#allocation7 + $0x2e0] ss:$28 sps:$4 sm:$0xff]   ;;  %v4467_v53 = vld [vmem:[#allocation7 + $0x314] ss:$28 sps:$4 sm:$0xff]  }
 0x29f   :  { %v4465_v55 = vld [vmem:[#allocation7 + $0x310] ss:$28 sps:$4 sm:$0xff]  }
 0x2a0   :  { %v1411_v60 = vpack.c.bf16 %v1406_v56, %v1406_v56  ;;  %3536 = vst [vmem:[%s5073_s10] sm:$0xff] %v1406_v56  ;;  %v4468_v56 = vld [vmem:[#allocation7 + $0x318] ss:$28 sps:$4 sm:$0xff]  }
 0x2a2   :  { %1659 = vmatmul.mubr.bf16.vlgmr.msra.gmra.mrb[4].mxu0 %v1411_v60  ;;  %1700 = vmatmul.mubr.bf16.vlgmr.msra.gmra.mrb[12].mxu1 %v1411_v60  ;;  %v4471_v60 = vld [vmem:[#allocation7 + $0x348] ss:$28 sps:$4 sm:$0xff]  }
 0x2a3   :  { %3162 = vmatpush1.bf16.msra.mxu0 %v4381_v57  ;;  %3244 = vmatpush1.bf16.msra.mxu1 %v4384_v59  ;;  %v4473_v57 = vld [vmem:[#allocation7 + $0x34c] ss:$28 sps:$4 sm:$0xff]   ;;  %v4476_v59 = vld [vmem:[#allocation7 + $0x354] ss:$28 sps:$4 sm:$0xff]  }
 0x2a4   :  { %3163 = vmatprep.subr.bf16.mxu0 %v4389_v61  ;;  %3245 = vmatprep.subr.bf16.mxu1 %v4392_v62  ;;  %v4474_v61 = vld [vmem:[#allocation7 + $0x350] ss:$28 sps:$4 sm:$0xff]   ;;  %v4479_v62 = vld [vmem:[#allocation7 + $0x384] ss:$28 sps:$4 sm:$0xff]  }
 0x2a7   :  { %3164 = vmatpush1.bf16.msra.mxu0 %v4387_v63  ;;  %3246 = vmatpush1.bf16.msra.mxu1 %v4390_v0  ;;  %v4482_v63 = vld [vmem:[#allocation7 + $0x38c] ss:$28 sps:$4 sm:$0xff]   ;;  %v4986_v0 = vld [vmem:[%s5069_s6] sm:$0xf] }
 0x2a8   :  { %3165 = vmatprep.subr.bf16.mxu0 %v4395_v1  ;;  %3247 = vmatprep.subr.bf16.mxu1 %v4398_v2  ;;  %v1449_v1 = vrot.slane %v4986_v0, %v4959_v25  ;;  %v1453_v2 = vrot.slane %v4986_v0, %v4965_v27 }
 0x2ab   :  { %3166 = vmatpush1.bf16.msra.mxu0 %v4393_v3  ;;  %3248 = vmatpush1.bf16.msra.mxu1 %v4396_v4  ;;  %v1461_v3 = vrot.slane %v4986_v0, %v4968_v28 }
 0x2ac   :  { %3167 = vmatprep.subr.bf16.mxu0 %v4401_v5  ;;  %3249 = vmatprep.subr.bf16.mxu1 %v4404_v6 }
 0x2af   :  { %3168 = vmatpush1.bf16.msra.mxu0 %v4399_v7  ;;  %3250 = vmatpush1.bf16.msra.mxu1 %v4402_v8 }
 0x2b0   :  { %3169 = vmatprep.subr.bf16.mxu0 %v4407_v9  ;;  %3251 = vmatprep.subr.bf16.mxu1 %v4410_v10 }
 0x2b3   :  { %3170 = vmatpush1.bf16.msra.mxu0 %v4405_v11  ;;  %3252 = vmatpush1.bf16.msra.mxu1 %v4408_v12 }
 0x2b4   :  { %3171 = vmatprep.subr.bf16.mxu0 %v4413_v13  ;;  %3253 = vmatprep.subr.bf16.mxu1 %v4416_v14 }
 0x2b7   :  { %3172 = vmatpush1.bf16.msra.mxu0 %v4411_v15  ;;  %3254 = vmatpush1.bf16.msra.mxu1 %v4414_v16 }
 0x2b8   :  { %3173 = vmatprep.subr.bf16.mxu0 %v4419_v17  ;;  %3255 = vmatprep.subr.bf16.mxu1 %v4422_v18 }
 0x2bb   :  { %3174 = vmatpush1.bf16.msra.mxu0 %v4417_v19  ;;  %3256 = vmatpush1.bf16.msra.mxu1 %v4420_v20  ;;  %v4477_v19 = vld [vmem:[#allocation7 + $0x380] ss:$28 sps:$4 sm:$0xff]   ;;  %v4480_v20 = vld [vmem:[#allocation7 + $0x388] ss:$28 sps:$4 sm:$0xff]  }
 0x2bc   :  { %3175 = vmatprep.subr.bf16.mxu0 %v4425_v21  ;;  %3257 = vmatprep.subr.bf16.mxu1 %v4428_v22  ;;  %v4485_v22 = vld [vmem:[#allocation7 + $0x3bc] ss:$28 sps:$4 sm:$0xff]  }
 0x2bf   :  { %3176 = vmatpush1.bf16.msra.mxu0 %v4423_v23  ;;  %3258 = vmatpush1.bf16.msra.mxu1 %v4426_v26  ;;  %v4488_v23 = vld [vmem:[#allocation7 + $0x3c4] ss:$28 sps:$4 sm:$0xff]  }
 0x2c0   :  { %3177 = vmatprep.subr.bf16.mxu0 %v4431_v29  ;;  %3259 = vmatprep.subr.bf16.mxu1 %v4434_v30  ;;  %v4483_v29 = vld [vmem:[#allocation7 + $0x3b8] ss:$28 sps:$4 sm:$0xff]   ;;  %v4486_v30 = vld [vmem:[#allocation7 + $0x3c0] ss:$28 sps:$4 sm:$0xff]  }
 0x2c3   :  { %3178 = vmatpush1.bf16.msra.mxu0 %v4429_v31  ;;  %3260 = vmatpush1.bf16.msra.mxu1 %v4432_v32  ;;  %v4491_v31 = vld [vmem:[#allocation7 + $0x3f4] ss:$28 sps:$4 sm:$0xff]   ;;  %v4494_v32 = vld [vmem:[#allocation7 + $0x3fc] ss:$28 sps:$4 sm:$0xff]  }
 0x2c4   :  { %3179 = vmatprep.subr.bf16.mxu0 %v4437_v33  ;;  %3261 = vmatprep.subr.bf16.mxu1 %v4440_v34  ;;  %v4489_v33 = vld [vmem:[#allocation7 + $0x3f0] ss:$28 sps:$4 sm:$0xff]   ;;  %v4492_v34 = vld [vmem:[#allocation7 + $0x3f8] ss:$28 sps:$4 sm:$0xff]  }
 0x2c7   :  { %3180 = vmatpush1.bf16.msra.mxu0 %v4435_v35  ;;  %3262 = vmatpush1.bf16.msra.mxu1 %v4438_v36  ;;  %v4497_v35 = vld [vmem:[#allocation7 + $0x42c] ss:$28 sps:$4 sm:$0xff]   ;;  %v4500_v36 = vld [vmem:[#allocation7 + $0x434] ss:$28 sps:$4 sm:$0xff]  }
 0x2c8   :  { %3181 = vmatprep.subr.bf16.mxu0 %v4443_v37  ;;  %3263 = vmatprep.subr.bf16.mxu1 %v4446_v38  ;;  %v4495_v37 = vld [vmem:[#allocation7 + $0x428] ss:$28 sps:$4 sm:$0xff]   ;;  %v4498_v38 = vld [vmem:[#allocation7 + $0x430] ss:$28 sps:$4 sm:$0xff]  }
 0x2cb   :  { %3182 = vmatpush1.bf16.msra.mxu0 %v4441_v39  ;;  %3264 = vmatpush1.bf16.msra.mxu1 %v4444_v40  ;;  %v4503_v39 = vld [vmem:[#allocation7 + $0x464] ss:$28 sps:$4 sm:$0xff]   ;;  %v4506_v40 = vld [vmem:[#allocation7 + $0x46c] ss:$28 sps:$4 sm:$0xff]  }
 0x2cc   :  { %3183 = vmatprep.subr.bf16.mxu0 %v4449_v41  ;;  %3265 = vmatprep.subr.bf16.mxu1 %v4452_v42  ;;  %v4501_v41 = vld [vmem:[#allocation7 + $0x460] ss:$28 sps:$4 sm:$0xff]   ;;  %v4504_v42 = vld [vmem:[#allocation7 + $0x468] ss:$28 sps:$4 sm:$0xff]  }
 0x2cf   :  { %3184 = vmatpush1.bf16.msra.mxu0 %v4447_v43  ;;  %3266 = vmatpush1.bf16.msra.mxu1 %v4450_v44  ;;  %v4509_v43 = vld [vmem:[#allocation7 + $0x49c] ss:$28 sps:$4 sm:$0xff]   ;;  %v4512_v44 = vld [vmem:[#allocation7 + $0x4a4] ss:$28 sps:$4 sm:$0xff]  }
 0x2d0   :  { %3185 = vmatprep.subr.bf16.mxu0 %v4455_v45  ;;  %3267 = vmatprep.subr.bf16.mxu1 %v4458_v46  ;;  %v4507_v45 = vld [vmem:[#allocation7 + $0x498] ss:$28 sps:$4 sm:$0xff]   ;;  %v4510_v46 = vld [vmem:[#allocation7 + $0x4a0] ss:$28 sps:$4 sm:$0xff]  }
 0x2d3   :  { %3186 = vmatpush1.bf16.msra.mxu0 %v4453_v47  ;;  %3268 = vmatpush1.bf16.msra.mxu1 %v4456_v48  ;;  %v4515_v47 = vld [vmem:[#allocation7 + $0x4d4] ss:$28 sps:$4 sm:$0xff]   ;;  %v4518_v48 = vld [vmem:[#allocation7 + $0x4dc] ss:$28 sps:$4 sm:$0xff]  }
 0x2d4   :  { %3187 = vmatprep.subr.bf16.mxu0 %v4461_v49  ;;  %3269 = vmatprep.subr.bf16.mxu1 %v4464_v50  ;;  %v4513_v49 = vld [vmem:[#allocation7 + $0x4d0] ss:$28 sps:$4 sm:$0xff]   ;;  %v4516_v50 = vld [vmem:[#allocation7 + $0x4d8] ss:$28 sps:$4 sm:$0xff]  }
 0x2d7   :  { %3188 = vmatpush1.bf16.msra.mxu0 %v4459_v51  ;;  %3270 = vmatpush1.bf16.msra.mxu1 %v4462_v52  ;;  %v4521_v51 = vld [vmem:[#allocation7 + $0x50c] ss:$28 sps:$4 sm:$0xff]   ;;  %v4524_v52 = vld [vmem:[#allocation7 + $0x514] ss:$28 sps:$4 sm:$0xff]  }
 0x2d8   :  { %3189 = vmatprep.subr.bf16.mxu0 %v4467_v53  ;;  %3271 = vmatprep.subr.bf16.mxu1 %v4470_v54  ;;  %v4519_v53 = vld [vmem:[#allocation7 + $0x508] ss:$28 sps:$4 sm:$0xff]   ;;  %v4522_v54 = vld [vmem:[#allocation7 + $0x510] ss:$28 sps:$4 sm:$0xff]  }
 0x2db   :  { %3190 = vmatpush1.bf16.msra.mxu0 %v4465_v55  ;;  %3272 = vmatpush1.bf16.msra.mxu1 %v4468_v56  ;;  %v4527_v55 = vld [vmem:[#allocation7 + $0x544] ss:$28 sps:$4 sm:$0xff]   ;;  %v4530_v56 = vld [vmem:[#allocation7 + $0x54c] ss:$28 sps:$4 sm:$0xff]  }
 0x2dc   :  { %3191 = vmatprep.subr.bf16.mxu0 %v4473_v57  ;;  %3273 = vmatprep.subr.bf16.mxu1 %v4476_v59  ;;  %v4525_v57 = vld [vmem:[#allocation7 + $0x540] ss:$28 sps:$4 sm:$0xff]   ;;  %v4528_v59 = vld [vmem:[#allocation7 + $0x548] ss:$28 sps:$4 sm:$0xff]  }
 0x2df   :  { %3192 = vmatpush1.bf16.msra.mxu0 %v4471_v60  ;;  %3274 = vmatpush1.bf16.msra.mxu1 %v4474_v61  ;;  %v4533_v60 = vld [vmem:[#allocation7 + $0x57c] ss:$28 sps:$4 sm:$0xff]   ;;  %v4536_v61 = vld [vmem:[#allocation7 + $0x584] ss:$28 sps:$4 sm:$0xff]  }
 0x2e0   :  { %3202 = vmatprep.subr.bf16.mxu0 %v4479_v62  ;;  %3284 = vmatprep.subr.bf16.mxu1 %v4482_v63  ;;  %v4531_v62 = vld [vmem:[#allocation7 + $0x578] ss:$28 sps:$4 sm:$0xff]   ;;  %v4534_v63 = vld [vmem:[#allocation7 + $0x580] ss:$28 sps:$4 sm:$0xff]  }
 0x375   :  { %v1660_v4 = vpop.f32.mrb[4].mxu0  ;;  %v4994_v5 = vpop.f32.mrb[12].mxu1 }
 0x376   :  { %v1661_v6 = vadd.f32 %v1660_v4, %v1449_v1  ;;  %v1662_v7 = vpop.f32.mrb[5].mxu0  ;;  %v1703_v8 = vpop.f32.mrb[13].mxu1  ;;  %v4539_v1 = vld [vmem:[#allocation7 + $0x5b4] ss:$28 sps:$4 sm:$0xff]  }
 0x377   :  { %v1663_v9 = vadd.f32 %v1662_v7, %v1453_v2  ;;  %v1704_v10 = vadd.f32 %v1703_v8, %v1461_v3  ;;  %v1664_v11 = vpop.f32.mrb[6].mxu0  ;;  %v1705_v12 = vpop.f32.mrb[14].mxu1  ;;  %v4542_v2 = vld [vmem:[#allocation7 + $0x5bc] ss:$28 sps:$4 sm:$0xff]   ;;  %v4537_v3 = vld [vmem:[#allocation7 + $0x5b0] ss:$28 sps:$4 sm:$0xff]  }
 0x378   :  { %v1708_v13 = vmax.f32 %v1661_v6, 0.0  ;;  %v1665_v14 = vpop.f32.mrb[7].mxu0  ;;  %v1706_v15 = vpop.f32.mrb[15].mxu1  ;;  %v4540_v4 = vld [vmem:[#allocation7 + $0x5b8] ss:$28 sps:$4 sm:$0xff]  }
 0x379   :  { %v1709_v16 = vmax.f32 %v1663_v9, 0.0  ;;  %v1711_v17 = vmax.f32 %v1704_v10, 0.0  ;;  %v4545_v6 = vld [vmem:[#allocation7 + $0x5ec] ss:$28 sps:$4 sm:$0xff]   ;;  %v4548_v7 = vld [vmem:[#allocation7 + $0x5f4] ss:$28 sps:$4 sm:$0xff]  }
 0x37a   :  { %v4998_v21 = vpack.c.bf16 %v1708_v13, %v1708_v13  ;;  %v4543_v8 = vld [vmem:[#allocation7 + $0x5e8] ss:$28 sps:$4 sm:$0xff]   ;;  %v4546_v9 = vld [vmem:[#allocation7 + $0x5f0] ss:$28 sps:$4 sm:$0xff]   ;;  %v4549_v12 = vld [vmem:[#allocation7 + $0x620] ss:$28 sps:$4 sm:$0xff]  }
 0x37b   :  { %v4996_v18 = vpack.c.bf16 %v1709_v16, %v1709_v16  ;;  %v5002_v26 = vpack.c.bf16 %v1711_v17, %v1711_v17  ;;  %v4551_v10 = vld [vmem:[#allocation7 + $0x624] ss:$28 sps:$4 sm:$0xff]   ;;  %v4554_v11 = vld [vmem:[#allocation7 + $0x62c] ss:$28 sps:$4 sm:$0xff]   ;;  %v4557_v14 = vld [vmem:[#allocation7 + $0x65c] ss:$28 sps:$4 sm:$0xff]  }
 0x37c   :  { %v4552_v13 = vld [vmem:[#allocation7 + $0x628] ss:$28 sps:$4 sm:$0xff]   ;;  %v4555_v16 = vld [vmem:[#allocation7 + $0x658] ss:$28 sps:$4 sm:$0xff]   ;;  %v4558_v17 = vld [vmem:[#allocation7 + $0x660] ss:$28 sps:$4 sm:$0xff]  }
 0x37d   :  { %3193 = vmatprep.mubr.bf16.mxu0 %v4996_v18  ;;  %3275 = vmatprep.mubr.bf16.mxu1 %v4996_v18  ;;  %v4560_v15 = vld [vmem:[#allocation7 + $0x664] ss:$28 sps:$4 sm:$0xff]  }
 0x37e   :  { %3194 = vmatmul.mubr.bf16.vlgmr.msra.gmra.mrb[8].mxu0 %v4998_v21  ;;  %3276 = vmatmul.mubr.bf16.vlgmr.msra.gmra.mrb[16].mxu1 %v4998_v21 }
 0x37f   :  { %3203 = vmatpush1.bf16.msra.mxu0 %v4477_v19  ;;  %3285 = vmatpush1.bf16.msra.mxu1 %v4480_v20  ;;  %v1457_v19 = vrot.slane %v4986_v0, %v4974_v58  ;;  %v4563_v20 = vld [vmem:[#allocation7 + $0x694] ss:$28 sps:$4 sm:$0xff]  }
 0x380   :  { %3234 = vmatprep.mubr.bf16.mxu0 %v5002_v26  ;;  %3316 = vmatprep.mubr.bf16.mxu1 %v5002_v26  ;;  %v4575_v0 = vld [vmem:[#allocation7 + $0x14] ss:$28 sps:$4 sm:$0xff]  }
 0x381   :  { %3204 = vmatprep.subr.bf16.mxu0 %v4485_v22  ;;  %3286 = vmatprep.subr.bf16.mxu1 %v4488_v23  ;;  %v4566_v22 = vld [vmem:[#allocation7 + $0x69c] ss:$28 sps:$4 sm:$0xff]   ;;  %v4561_v23 = vld [vmem:[#allocation7 + $0x690] ss:$28 sps:$4 sm:$0xff]  }
 0x383   :  { %3205 = vmatpush1.bf16.msra.mxu0 %v4483_v29  ;;  %3287 = vmatpush1.bf16.msra.mxu1 %v4486_v30  ;;  %v4564_v29 = vld [vmem:[#allocation7 + $0x698] ss:$28 sps:$4 sm:$0xff]   ;;  %v1702_v30 = vadd.f32 %v4994_v5, %v1457_v19  ;;  %v4631_v19 = vld [vmem:[#allocation7 + $0x600] ss:$28 sps:$4 sm:$0xff]  }
 0x384   :  { %3206 = vmatprep.subr.bf16.mxu0 %v4491_v31  ;;  %3288 = vmatprep.subr.bf16.mxu1 %v4494_v32  ;;  %v4569_v31 = vld [vmem:[#allocation7 + $0x6cc] ss:$28 sps:$4 sm:$0xff]   ;;  %v4572_v32 = vld [vmem:[#allocation7 + $0x6d4] ss:$28 sps:$4 sm:$0xff]  }
 0x385   :  { %v4577_v5 = vld [vmem:[#allocation7 + $0x18] ss:$28 sps:$4 sm:$0xff]  }
 0x387   :  { %3207 = vmatpush1.bf16.msra.mxu0 %v4489_v33  ;;  %3289 = vmatpush1.bf16.msra.mxu1 %v4492_v34  ;;  %v4567_v33 = vld [vmem:[#allocation7 + $0x6c8] ss:$28 sps:$4 sm:$0xff]   ;;  %v4570_v34 = vld [vmem:[#allocation7 + $0x6d0] ss:$28 sps:$4 sm:$0xff]  }
 0x388   :  { %3208 = vmatprep.subr.bf16.mxu0 %v4497_v35  ;;  %3290 = vmatprep.subr.bf16.mxu1 %v4500_v36  ;;  %v1710_v35 = vmax.f32 %v1702_v30, 0.0  ;;  %v4576_v36 = vld [vmem:[#allocation7 + $0x1d8] ss:$28 sps:$4 sm:$0xff]   ;;  %v4633_v30 = vld [vmem:[#allocation7 + $0x2b0] ss:$28 sps:$4 sm:$0xff]  }
 0x38b   :  { %3209 = vmatpush1.bf16.msra.mxu0 %v4495_v37  ;;  %3291 = vmatpush1.bf16.msra.mxu1 %v4498_v38  ;;  %v4573_v37 = vld [vmem:[#allocation7 + $0x10] ss:$28 sps:$4 sm:$0xff]   ;;  %v5011_v38 = vpack.c.bf16 %v1710_v35, %v1710_v35 }
 0x38c   :  { %3210 = vmatprep.subr.bf16.mxu0 %v4503_v39  ;;  %3292 = vmatprep.subr.bf16.mxu1 %v4506_v40  ;;  %v4580_v39 = vld [vmem:[#allocation7 + $0x4c] ss:$28 sps:$4 sm:$0xff]  }
 0x38d   :  { %v4581_v40 = vld [vmem:[#allocation7 + $0x210] ss:$28 sps:$4 sm:$0xff]  }
 0x38e   :  { %v4642_v35 = vld [vmem:[#allocation7 + $0x4b0] ss:$28 sps:$4 sm:$0xff]  }
 0x38f   :  { %3211 = vmatpush1.bf16.msra.mxu0 %v4501_v41  ;;  %3293 = vmatpush1.bf16.msra.mxu1 %v4504_v42  ;;  %v4578_v41 = vld [vmem:[#allocation7 + $0x48] ss:$28 sps:$4 sm:$0xff]   ;;  %v4582_v42 = vld [vmem:[#allocation7 + $0x50] ss:$28 sps:$4 sm:$0xff]  }
 0x390   :  { %3212 = vmatprep.subr.bf16.mxu0 %v4509_v43  ;;  %3294 = vmatprep.subr.bf16.mxu1 %v4512_v44  ;;  %v4585_v43 = vld [vmem:[#allocation7 + $0x84] ss:$28 sps:$4 sm:$0xff]  }
 0x391   :  { %v4586_v44 = vld [vmem:[#allocation7 + $0x248] ss:$28 sps:$4 sm:$0xff]  }
 0x393   :  { %3213 = vmatpush1.bf16.msra.mxu0 %v4507_v45  ;;  %3295 = vmatpush1.bf16.msra.mxu1 %v4510_v46  ;;  %v4583_v45 = vld [vmem:[#allocation7 + $0x80] ss:$28 sps:$4 sm:$0xff]   ;;  %v4587_v46 = vld [vmem:[#allocation7 + $0x88] ss:$28 sps:$4 sm:$0xff]  }
 0x394   :  { %3214 = vmatprep.subr.bf16.mxu0 %v4515_v47  ;;  %3296 = vmatprep.subr.bf16.mxu1 %v4518_v48  ;;  %v4590_v47 = vld [vmem:[#allocation7 + $0xbc] ss:$28 sps:$4 sm:$0xff]  }
 0x395   :  { %v4591_v48 = vld [vmem:[#allocation7 + $0x280] ss:$28 sps:$4 sm:$0xff]  }
 0x397   :  { %3215 = vmatpush1.bf16.msra.mxu0 %v4513_v49  ;;  %3297 = vmatpush1.bf16.msra.mxu1 %v4516_v50  ;;  %v4588_v49 = vld [vmem:[#allocation7 + $0xb8] ss:$28 sps:$4 sm:$0xff]   ;;  %v4592_v50 = vld [vmem:[#allocation7 + $0xc0] ss:$28 sps:$4 sm:$0xff]  }
 0x398   :  { %3216 = vmatprep.subr.bf16.mxu0 %v4521_v51  ;;  %3298 = vmatprep.subr.bf16.mxu1 %v4524_v52  ;;  %v4595_v51 = vld [vmem:[#allocation7 + $0xf4] ss:$28 sps:$4 sm:$0xff]  }
 0x399   :  { %v4593_v52 = vld [vmem:[#allocation7 + $0xf0] ss:$28 sps:$4 sm:$0xff]  }
 0x39b   :  { %3217 = vmatpush1.bf16.msra.mxu0 %v4519_v53  ;;  %3299 = vmatpush1.bf16.msra.mxu1 %v4522_v54  ;;  %v4597_v53 = vld [vmem:[#allocation7 + $0xf8] ss:$28 sps:$4 sm:$0xff]   ;;  %v4600_v54 = vld [vmem:[#allocation7 + $0x12c] ss:$28 sps:$4 sm:$0xff]  }
 0x39c   :  { %3218 = vmatprep.subr.bf16.mxu0 %v4527_v55  ;;  %3300 = vmatprep.subr.bf16.mxu1 %v4530_v56  ;;  %v4601_v55 = vld [vmem:[#allocation7 + $0x2f0] ss:$28 sps:$4 sm:$0xff]   ;;  %v4598_v56 = vld [vmem:[#allocation7 + $0x128] ss:$28 sps:$4 sm:$0xff]  }
 0x39f   :  { %3219 = vmatpush1.bf16.msra.mxu0 %v4525_v57  ;;  %3301 = vmatpush1.bf16.msra.mxu1 %v4528_v59  ;;  %v4602_v57 = vld [vmem:[#allocation7 + $0x130] ss:$28 sps:$4 sm:$0xff]   ;;  %v4605_v59 = vld [vmem:[#allocation7 + $0x164] ss:$28 sps:$4 sm:$0xff]  }
 0x3a0   :  { %3220 = vmatprep.subr.bf16.mxu0 %v4533_v60  ;;  %3302 = vmatprep.subr.bf16.mxu1 %v4536_v61  ;;  %v4606_v60 = vld [vmem:[#allocation7 + $0x328] ss:$28 sps:$4 sm:$0xff]   ;;  %v4603_v61 = vld [vmem:[#allocation7 + $0x160] ss:$28 sps:$4 sm:$0xff]  }
 0x3a3   :  { %3221 = vmatpush1.bf16.msra.mxu0 %v4531_v62  ;;  %3303 = vmatpush1.bf16.msra.mxu1 %v4534_v63  ;;  %v4607_v62 = vld [vmem:[#allocation7 + $0x168] ss:$28 sps:$4 sm:$0xff]   ;;  %v4610_v63 = vld [vmem:[#allocation7 + $0x19c] ss:$28 sps:$4 sm:$0xff]  }
 0x3a4   :  { %3222 = vmatprep.subr.bf16.mxu0 %v4539_v1  ;;  %3304 = vmatprep.subr.bf16.mxu1 %v4542_v2  ;;  %v4611_v1 = vld [vmem:[#allocation7 + $0x360] ss:$28 sps:$4 sm:$0xff]   ;;  %v4608_v2 = vld [vmem:[#allocation7 + $0x198] ss:$28 sps:$4 sm:$0xff]  }
 0x3a7   :  { %3223 = vmatpush1.bf16.msra.mxu0 %v4537_v3  ;;  %3305 = vmatpush1.bf16.msra.mxu1 %v4540_v4  ;;  %v4612_v3 = vld [vmem:[#allocation7 + $0x1a0] ss:$28 sps:$4 sm:$0xff]   ;;  %v4615_v4 = vld [vmem:[#allocation7 + $0x1d4] ss:$28 sps:$4 sm:$0xff]  }
 0x3a8   :  { %3224 = vmatprep.subr.bf16.mxu0 %v4545_v6  ;;  %3306 = vmatprep.subr.bf16.mxu1 %v4548_v7  ;;  %v4616_v6 = vld [vmem:[#allocation7 + $0x558] ss:$28 sps:$4 sm:$0xff]   ;;  %v4613_v7 = vld [vmem:[#allocation7 + $0x1d0] ss:$28 sps:$4 sm:$0xff]  }
 0x3ab   :  { %3225 = vmatpush1.bf16.msra.mxu0 %v4543_v8  ;;  %3307 = vmatpush1.bf16.msra.mxu1 %v4546_v9  ;;  %v4617_v8 = vld [vmem:[#allocation7 + $0x398] ss:$28 sps:$4 sm:$0xff]   ;;  %v4620_v9 = vld [vmem:[#allocation7 + $0x20c] ss:$28 sps:$4 sm:$0xff]  }
 0x3ac   :  { %3226 = vmatprep.subr.bf16.mxu0 %v4551_v10  ;;  %3308 = vmatprep.subr.bf16.mxu1 %v4554_v11  ;;  %v4621_v10 = vld [vmem:[#allocation7 + $0x590] ss:$28 sps:$4 sm:$0xff]   ;;  %v4618_v11 = vld [vmem:[#allocation7 + $0x208] ss:$28 sps:$4 sm:$0xff]  }
 0x3af   :  { %3227 = vmatpush1.bf16.msra.mxu0 %v4549_v12  ;;  %3309 = vmatpush1.bf16.msra.mxu1 %v4552_v13  ;;  %v4622_v12 = vld [vmem:[#allocation7 + $0x3d0] ss:$28 sps:$4 sm:$0xff]   ;;  %v4625_v13 = vld [vmem:[#allocation7 + $0x244] ss:$28 sps:$4 sm:$0xff]  }
 0x3b0   :  { %3228 = vmatprep.subr.bf16.mxu0 %v4557_v14  ;;  %3310 = vmatprep.subr.bf16.mxu1 %v4560_v15  ;;  %v4626_v14 = vld [vmem:[#allocation7 + $0x5c8] ss:$28 sps:$4 sm:$0xff]   ;;  %v4623_v15 = vld [vmem:[#allocation7 + $0x240] ss:$28 sps:$4 sm:$0xff]  }
 0x3b3   :  { %3229 = vmatpush1.bf16.msra.mxu0 %v4555_v16  ;;  %3311 = vmatpush1.bf16.msra.mxu1 %v4558_v17  ;;  %v4627_v16 = vld [vmem:[#allocation7 + $0x408] ss:$28 sps:$4 sm:$0xff]   ;;  %v4630_v17 = vld [vmem:[#allocation7 + $0x27c] ss:$28 sps:$4 sm:$0xff]  }
 0x3b4   :  { %3230 = vmatprep.subr.bf16.mxu0 %v4563_v20  ;;  %3312 = vmatprep.subr.bf16.mxu1 %v4566_v22  ;;  %v4628_v20 = vld [vmem:[#allocation7 + $0x278] ss:$28 sps:$4 sm:$0xff]   ;;  %v4632_v22 = vld [vmem:[#allocation7 + $0x440] ss:$28 sps:$4 sm:$0xff]  }
 0x3b7   :  { %3231 = vmatpush1.bf16.msra.mxu0 %v4561_v23  ;;  %3313 = vmatpush1.bf16.msra.mxu1 %v4564_v29  ;;  %v4635_v23 = vld [vmem:[#allocation7 + $0x2b4] ss:$28 sps:$4 sm:$0xff]  }
 0x3b8   :  { %3232 = vmatprep.subr.bf16.mxu0 %v4569_v31  ;;  %3314 = vmatprep.subr.bf16.mxu1 %v4572_v32  ;;  %v4636_v29 = vld [vmem:[#allocation7 + $0x638] ss:$28 sps:$4 sm:$0xff]   ;;  %v4640_v32 = vld [vmem:[#allocation7 + $0x2ec] ss:$28 sps:$4 sm:$0xff]  }
 0x3b9   :  { %v4637_v31 = vld [vmem:[#allocation7 + $0x478] ss:$28 sps:$4 sm:$0xff]  }
 0x3bb   :  { %3233 = vmatpush1.bf16.msra.mxu0 %v4567_v33  ;;  %3315 = vmatpush1.bf16.msra.mxu1 %v4570_v34  ;;  %v4641_v33 = vld [vmem:[#allocation7 + $0x670] ss:$28 sps:$4 sm:$0xff]   ;;  %v4638_v34 = vld [vmem:[#allocation7 + $0x2e8] ss:$28 sps:$4 sm:$0xff]  }
 0x3bc   :  { %3325 = vmatprep.subr.bf16.mxu0 %v4575_v0  ;;  %4020 = vmatprep.subr.bf16.mxu1 %v4576_v36  ;;  %v4645_v0 = vld [vmem:[#allocation7 + $0x324] ss:$28 sps:$4 sm:$0xff]  }
 0x3bd   :  { %v4646_v36 = vld [vmem:[#allocation7 + $0x6a8] ss:$28 sps:$4 sm:$0xff]  }
 0x3be   :  { %3235 = vmatmul.mubr.bf16.vlgmr.msra.gmra.mrb[8].mxu0 %v5011_v38  ;;  %3317 = vmatmul.mubr.bf16.vlgmr.msra.gmra.mrb[16].mxu1 %v5011_v38 }
 0x3bf   :  { %3326 = vmatpush1.bf16.msra.mxu0 %v4573_v37  ;;  %3357 = vmatprep.mubr.bf16.mxu0 %v4996_v18  ;;  %v4643_v37 = vld [vmem:[#allocation7 + $0x320] ss:$28 sps:$4 sm:$0xff]  }
 0x3c0   :  { %4021 = vmatpush3.bf16.msra.mxu1 %v4577_v5  ;;  %3439 = vmatprep.mubr.bf16.mxu1 %v4996_v18  ;;  %v4596_v18 = vld [vmem:[#allocation7 + $0x2b8] ss:$28 sps:$4 sm:$0xff]   ;;  %v4647_v5 = vld [vmem:[#allocation7 + $0x4e8] ss:$28 sps:$4 sm:$0xff]  }
 0x3c1   :  { %3327 = vmatprep.subr.bf16.mxu0 %v4580_v39  ;;  %4022 = vmatprep.subr.bf16.mxu1 %v4581_v40  ;;  %v4650_v39 = vld [vmem:[#allocation7 + $0x35c] ss:$28 sps:$4 sm:$0xff]  }
 0x3c2   :  { %v4651_v40 = vld [vmem:[#allocation7 + $0x6e0] ss:$28 sps:$4 sm:$0xff]  }
 0x3c3   :  { %3328 = vmatpush1.bf16.msra.mxu0 %v4578_v41  ;;  %v4648_v41 = vld [vmem:[#allocation7 + $0x358] ss:$28 sps:$4 sm:$0xff]  }
 0x3c4   :  { %4023 = vmatpush3.bf16.msra.mxu1 %v4582_v42  ;;  %3329 = vmatprep.subr.bf16.mxu0 %v4585_v43  ;;  %v4652_v42 = vld [vmem:[#allocation7 + $0x520] ss:$28 sps:$4 sm:$0xff]   ;;  %v4655_v43 = vld [vmem:[#allocation7 + $0x394] ss:$28 sps:$4 sm:$0xff]  }
 0x3c5   :  { %4024 = vmatprep.subr.bf16.mxu1 %v4586_v44  ;;  %v4653_v44 = vld [vmem:[#allocation7 + $0x390] ss:$28 sps:$4 sm:$0xff]  }
 0x3c7   :  { %3330 = vmatpush1.bf16.msra.mxu0 %v4583_v45  ;;  %v4658_v45 = vld [vmem:[#allocation7 + $0x3cc] ss:$28 sps:$4 sm:$0xff]  }
 0x3c8   :  { %4025 = vmatpush3.bf16.msra.mxu1 %v4587_v46  ;;  %3331 = vmatprep.subr.bf16.mxu0 %v4590_v47  ;;  %v4656_v46 = vld [vmem:[#allocation7 + $0x3c8] ss:$28 sps:$4 sm:$0xff]  }
 0x3c9   :  { %4026 = vmatprep.subr.bf16.mxu1 %v4591_v48  ;;  %v4661_v47 = vld [vmem:[#allocation7 + $0x404] ss:$28 sps:$4 sm:$0xff]  }
 0x3ca   :  { %v4659_v48 = vld [vmem:[#allocation7 + $0x400] ss:$28 sps:$4 sm:$0xff]  }
 0x3cb   :  { %3332 = vmatpush1.bf16.msra.mxu0 %v4588_v49  ;;  %v4664_v49 = vld [vmem:[#allocation7 + $0x43c] ss:$28 sps:$4 sm:$0xff]  }
 0x3cc   :  { %4027 = vmatpush3.bf16.msra.mxu1 %v4592_v50  ;;  %3333 = vmatprep.subr.bf16.mxu0 %v4595_v51  ;;  %v4662_v50 = vld [vmem:[#allocation7 + $0x438] ss:$28 sps:$4 sm:$0xff]  }
 0x3cd   :  { %4028 = vmatprep.subr.bf16.mxu1 %v4596_v18  ;;  %v4667_v51 = vld [vmem:[#allocation7 + $0x474] ss:$28 sps:$4 sm:$0xff]  }
 0x3ce   :  { %v4665_v18 = vld [vmem:[#allocation7 + $0x470] ss:$28 sps:$4 sm:$0xff]  }
 0x3cf   :  { %3334 = vmatpush1.bf16.msra.mxu0 %v4593_v52  ;;  %v4668_v52 = vld [vmem:[#allocation7 + $0x4a8] ss:$28 sps:$4 sm:$0xff]  }
 0x3d0   :  { %4029 = vmatpush3.bf16.msra.mxu1 %v4597_v53  ;;  %3335 = vmatprep.subr.bf16.mxu0 %v4600_v54  ;;  %v4673_v53 = vld [vmem:[#allocation7 + $0x4e4] ss:$28 sps:$4 sm:$0xff]   ;;  %v4676_v54 = vld [vmem:[#allocation7 + $0x51c] ss:$28 sps:$4 sm:$0xff]  }
 0x3d1   :  { %4030 = vmatprep.subr.bf16.mxu1 %v4601_v55  ;;  %v4674_v55 = vld [vmem:[#allocation7 + $0x518] ss:$28 sps:$4 sm:$0xff]  }
 0x3d3   :  { %3336 = vmatpush1.bf16.msra.mxu0 %v4598_v56  ;;  %v4679_v56 = vld [vmem:[#allocation7 + $0x554] ss:$28 sps:$4 sm:$0xff]  }
 0x3d4   :  { %4031 = vmatpush3.bf16.msra.mxu1 %v4602_v57  ;;  %3337 = vmatprep.subr.bf16.mxu0 %v4605_v59  ;;  %v4677_v57 = vld [vmem:[#allocation7 + $0x550] ss:$28 sps:$4 sm:$0xff]  }
 0x3d5   :  { %4032 = vmatprep.subr.bf16.mxu1 %v4606_v60  ;;  %v4682_v59 = vld [vmem:[#allocation7 + $0x58c] ss:$28 sps:$4 sm:$0xff]  }
 0x3d6   :  { %v4680_v60 = vld [vmem:[#allocation7 + $0x588] ss:$28 sps:$4 sm:$0xff]  }
 0x3d7   :  { %3338 = vmatpush1.bf16.msra.mxu0 %v4603_v61  ;;  %v4685_v61 = vld [vmem:[#allocation7 + $0x5c4] ss:$28 sps:$4 sm:$0xff]  }
 0x3d8   :  { %4033 = vmatpush3.bf16.msra.mxu1 %v4607_v62  ;;  %3339 = vmatprep.subr.bf16.mxu0 %v4610_v63  ;;  %v4683_v62 = vld [vmem:[#allocation7 + $0x5c0] ss:$28 sps:$4 sm:$0xff]  }
 0x3d9   :  { %4034 = vmatprep.subr.bf16.mxu1 %v4611_v1  ;;  %v4688_v63 = vld [vmem:[#allocation7 + $0x5fc] ss:$28 sps:$4 sm:$0xff]  }
 0x3da   :  { %v4686_v1 = vld [vmem:[#allocation7 + $0x5f8] ss:$28 sps:$4 sm:$0xff]  }
 0x3db   :  { %3340 = vmatpush1.bf16.msra.mxu0 %v4608_v2  ;;  %v4691_v2 = vld [vmem:[#allocation7 + $0x634] ss:$28 sps:$4 sm:$0xff]  }
 0x3dc   :  { %4035 = vmatpush3.bf16.msra.mxu1 %v4612_v3  ;;  %3341 = vmatprep.subr.bf16.mxu0 %v4615_v4  ;;  %v4689_v3 = vld [vmem:[#allocation7 + $0x630] ss:$28 sps:$4 sm:$0xff]  }
 0x3dd   :  { %4042 = vmatprep.subr.bf16.mxu1 %v4616_v6  ;;  %v4694_v4 = vld [vmem:[#allocation7 + $0x66c] ss:$28 sps:$4 sm:$0xff]  }
 0x3de   :  { %v4692_v6 = vld [vmem:[#allocation7 + $0x668] ss:$28 sps:$4 sm:$0xff]  }
 0x3df   :  { %3440 = vmatmul.mubr.bf16.vlgmr.msra.gmra.mrb[20].mxu1 %v4998_v21  ;;  %3342 = vmatpush1.bf16.msra.mxu0 %v4613_v7  ;;  %v4697_v7 = vld [vmem:[#allocation7 + $0x6a4] ss:$28 sps:$4 sm:$0xff]  }
 0x3e0   :  { %4043 = vmatpush3.bf16.msra.mxu1 %v4617_v8  ;;  %3479 = vmatprep.mubr.bf16.mxu1 %v5002_v26  ;;  %v4695_v8 = vld [vmem:[#allocation7 + $0x6a0] ss:$28 sps:$4 sm:$0xff]  }
 0x3e1   :  { %3343 = vmatprep.subr.bf16.mxu0 %v4620_v9  ;;  %4044 = vmatprep.subr.bf16.mxu1 %v4621_v10  ;;  %v4700_v9 = vld [vmem:[#allocation7 + $0x6dc] ss:$28 sps:$4 sm:$0xff]  }
 0x3e2   :  { %v4698_v10 = vld [vmem:[#allocation7 + $0x6d8] ss:$28 sps:$4 sm:$0xff]  }
 0x3e3   :  { %3344 = vmatpush1.bf16.msra.mxu0 %v4618_v11  ;;  %v5026_v11 = vld [vmem:[%s5071_s8] sm:$0xff] }
 0x3e4   :  { %4045 = vmatpush3.bf16.msra.mxu1 %v4622_v12  ;;  %3345 = vmatprep.subr.bf16.mxu0 %v4625_v13  ;;  %v1977_v12 = vrot.slane %v5026_v11, %v4959_v25  ;;  %v1985_v13 = vrot.slane %v5026_v11, %v4974_v58 }
 0x3e5   :  { %4046 = vmatprep.subr.bf16.mxu1 %v4626_v14  ;;  %v1981_v14 = vrot.slane %v5026_v11, %v4965_v27 }
 0x3e7   :  { %3346 = vmatpush1.bf16.msra.mxu0 %v4623_v15  ;;  %v1989_v15 = vrot.slane %v5026_v11, %v4968_v28 }
 0x3e8   :  { %4047 = vmatpush3.bf16.msra.mxu1 %v4627_v16  ;;  %3347 = vmatprep.subr.bf16.mxu0 %v4630_v17 }
 0x3e9   :  { %4048 = vmatprep.subr.bf16.mxu1 %v4631_v19 }
 0x3eb   :  { %3348 = vmatpush1.bf16.msra.mxu0 %v4628_v20 }
 0x3ec   :  { %4049 = vmatpush3.bf16.msra.mxu1 %v4632_v22  ;;  %3349 = vmatprep.subr.bf16.mxu0 %v4635_v23 }
 0x3ed   :  { %4050 = vmatprep.subr.bf16.mxu1 %v4636_v29 }
 0x3ef   :  { %3350 = vmatpush1.bf16.msra.mxu0 %v4633_v30 }
 0x3f0   :  { %4051 = vmatpush3.bf16.msra.mxu1 %v4637_v31  ;;  %3351 = vmatprep.subr.bf16.mxu0 %v4640_v32 }
 0x3f1   :  { %4052 = vmatprep.subr.bf16.mxu1 %v4641_v33 }
 0x3f3   :  { %3352 = vmatpush1.bf16.msra.mxu0 %v4638_v34 }
 0x3f4   :  { %4053 = vmatpush3.bf16.msra.mxu1 %v4642_v35  ;;  %3353 = vmatprep.subr.bf16.mxu0 %v4645_v0 }
 0x3f5   :  { %4054 = vmatprep.subr.bf16.mxu1 %v4646_v36 }
 0x3f7   :  { %3354 = vmatpush1.bf16.msra.mxu0 %v4643_v37 }
 0x3f8   :  { %4055 = vmatpush3.bf16.msra.mxu1 %v4647_v5  ;;  %3355 = vmatprep.subr.bf16.mxu0 %v4650_v39 }
 0x3f9   :  { %4056 = vmatprep.subr.bf16.mxu1 %v4651_v40 }
 0x3fb   :  { %3356 = vmatpush1.bf16.msra.mxu0 %v4648_v41 }
 0x3fc   :  { %4057 = vmatpush3.bf16.msra.mxu1 %v4652_v42  ;;  %3366 = vmatprep.subr.bf16.mxu0 %v4655_v43 }
 0x3fe   :  { %3358 = vmatmul.mubr.bf16.vlgmr.msra.gmra.mrb[12].mxu0 %v4998_v21  ;;  %v4670_v21 = vld [vmem:[#allocation7 + $0x4ac] ss:$28 sps:$4 sm:$0xff]  }
 0x3ff   :  { %3480 = vmatmul.mubr.bf16.vlgmr.msra.gmra.mrb[24].mxu1 %v5011_v38  ;;  %3367 = vmatpush1.bf16.msra.mxu0 %v4653_v44 }
 0x400   :  { %3398 = vmatprep.mubr.bf16.mxu0 %v5002_v26  ;;  %3368 = vmatprep.subr.bf16.mxu0 %v4658_v45  ;;  %v4671_v26 = vld [vmem:[#allocation7 + $0x4e0] ss:$28 sps:$4 sm:$0xff]  }
 0x403   :  { %3369 = vmatpush1.bf16.msra.mxu0 %v4656_v46 }
 0x404   :  { %3370 = vmatprep.subr.bf16.mxu0 %v4661_v47 }
 0x407   :  { %3371 = vmatpush1.bf16.msra.mxu0 %v4659_v48 }
 0x408   :  { %3372 = vmatprep.subr.bf16.mxu0 %v4664_v49 }
 0x40b   :  { %3373 = vmatpush1.bf16.msra.mxu0 %v4662_v50  ;;  %v2000_v50 = vsub.s32 6, %v4956_v24 }
 0x40c   :  { %3374 = vmatprep.subr.bf16.mxu0 %v4667_v51 }
 0x40d   :  { %v2001_v51 = vrot.slane %v5026_v11, %v2000_v50 }
 0x40f   :  { %3375 = vmatpush1.bf16.msra.mxu0 %v4665_v18 }
 0x410   :  { %3376 = vmatprep.subr.bf16.mxu0 %v4670_v21 }
 0x413   :  { %3377 = vmatpush1.bf16.msra.mxu0 %v4668_v52 }
 0x414   :  { %3378 = vmatprep.subr.bf16.mxu0 %v4673_v53 }
 0x417   :  { %3379 = vmatpush1.bf16.msra.mxu0 %v4671_v26 }
 0x418   :  { %3380 = vmatprep.subr.bf16.mxu0 %v4676_v54 }
 0x41b   :  { %3381 = vmatpush1.bf16.msra.mxu0 %v4674_v55 }
 0x41c   :  { %3382 = vmatprep.subr.bf16.mxu0 %v4679_v56 }
 0x41f   :  { %3383 = vmatpush1.bf16.msra.mxu0 %v4677_v57 }
 0x420   :  { %3384 = vmatprep.subr.bf16.mxu0 %v4682_v59 }
 0x423   :  { %3385 = vmatpush1.bf16.msra.mxu0 %v4680_v60 }
 0x424   :  { %3386 = vmatprep.subr.bf16.mxu0 %v4685_v61  ;;  %v1992_v61 = vsub.s32 4, %v4956_v24 }
 0x427   :  { %3387 = vmatpush1.bf16.msra.mxu0 %v4683_v62  ;;  %v1996_v62 = vsub.s32 5, %v4956_v24 }
 0x428   :  { %3388 = vmatprep.subr.bf16.mxu0 %v4688_v63  ;;  %v1993_v63 = vrot.slane %v5026_v11, %v1992_v61 }
 0x42b   :  { %3389 = vmatpush1.bf16.msra.mxu0 %v4686_v1  ;;  %v1997_v1 = vrot.slane %v5026_v11, %v1996_v62 }
 0x42c   :  { %3390 = vmatprep.subr.bf16.mxu0 %v4691_v2 }
 0x42f   :  { %3391 = vmatpush1.bf16.msra.mxu0 %v4689_v3 }
 0x430   :  { %3392 = vmatprep.subr.bf16.mxu0 %v4694_v4 }
 0x433   :  { %3393 = vmatpush1.bf16.msra.mxu0 %v4692_v6 }
 0x434   :  { %3394 = vmatprep.subr.bf16.mxu0 %v4697_v7 }
 0x437   :  { %3395 = vmatpush1.bf16.msra.mxu0 %v4695_v8 }
 0x438   :  { %3396 = vmatprep.subr.bf16.mxu0 %v4700_v9 }
 0x43b   :  { %3397 = vmatpush1.bf16.msra.mxu0 %v4698_v10 }
 0x43e   :  { %3399 = vmatmul.mubr.bf16.vlgmr.msra.gmra.mrb[12].mxu0 %v5011_v38 }
 0x491   :  { %v3236_v16 = vpop.f32.mrb[8].mxu0  ;;  %v3318_v17 = vpop.f32.mrb[16].mxu1 }
 0x492   :  { %v4068_v38 = vadd.f32 %v3236_v16, %v1977_v12  ;;  %v4070_v19 = vadd.f32 %v3318_v17, %v1985_v13  ;;  %v3238_v20 = vpop.f32.mrb[9].mxu0  ;;  %v3320_v22 = vpop.f32.mrb[17].mxu1 }
 0x493   :  { %v4069_v23 = vadd.f32 %v3238_v20, %v1981_v14  ;;  %v4071_v29 = vadd.f32 %v3320_v22, %v1989_v15  ;;  %v3240_v30 = vpop.f32.mrb[10].mxu0  ;;  %v3322_v31 = vpop.f32.mrb[18].mxu1 }
 0x494   :  { %v3969_v25 = vmul.f32 -1.442695, %v4068_v38  ;;  %v3971_v32 = vmul.f32 -1.442695, %v4070_v19  ;;  %v3241_v33 = vpop.f32.mrb[11].mxu0  ;;  %v3323_v58 = vpop.f32.mrb[19].mxu1 }
 0x495   :  { %v3970_v34 = vmul.f32 -1.442695, %v4069_v23  ;;  %v3972_v35 = vmul.f32 -1.442695, %v4071_v29 }
 0x496   :  { %4701 = vpow2.f32 %v3969_v25 }
 0x497   :  { %4703 = vpow2.f32 %v3971_v32 }
 0x498   :  { %4705 = vpow2.f32 %v3970_v34 }
 0x499   :  { %4707 = vpow2.f32 %v3972_v35 }
 0x4a0   :  { %v4702_v27 = vpop.eup %4701 }
 0x4a1   :  { %v4704_v28 = vpop.eup %4703  ;;  %v3508_v0 = vadd.f32 1.0, %v4702_v27 }
 0x4a2   :  { %v4706_v36 = vpop.eup %4705  ;;  %v3510_v37 = vadd.f32 1.0, %v4704_v28 }
 0x4a3   :  { %v4708_v5 = vpop.eup %4707  ;;  %4709 = vrcp.f32 %v3508_v0  ;;  %v3509_v39 = vadd.f32 1.0, %v4706_v36 }
 0x4a4   :  { %4711 = vrcp.f32 %v3510_v37  ;;  %v3511_v40 = vadd.f32 1.0, %v4708_v5 }
 0x4a5   :  { %4713 = vrcp.f32 %v3509_v39 }
 0x4a6   :  { %4715 = vrcp.f32 %v3511_v40 }
 0x4ad   :  { %v4710_v41 = vpop.eup %4709 }
 0x4ae   :  { %v4712_v42 = vpop.eup %4711  ;;  %3529 = vst [vmem:[%s5072_s9] sm:$0xff] %v4710_v41 }
 0x4af   :  { %v4714_v43 = vpop.eup %4713  ;;  %3531 = vst [vmem:[%s5072_s9 + $0x10] sm:$0xff] %v4712_v42 }
 0x4b0   :  { %v4716_v44 = vpop.eup %4715  ;;  %3530 = vst [vmem:[%s5072_s9 + $0x8] sm:$0xff] %v4714_v43 }
 0x4b1   :  { %3532 = vst [vmem:[%s5072_s9 + $0x18] sm:$0xff] %v4716_v44 }
 0x4b2   :  { %v4036_v45 = vpop.f32.mrb[20].mxu1 }
 0x4b3   :  { %v4037_v46 = vpop.f32.mrb[21].mxu1 }
 0x4b4   :  { %v4038_v47 = vadd.f32 %v4037_v46, %v4036_v45  ;;  %v4039_v48 = vpop.f32.mrb[22].mxu1 }
 0x4b5   :  { %v4040_v49 = vpop.f32.mrb[23].mxu1 }
 0x4b6   :  { %v3442_v52 = vadd.f32 %v4038_v47, %v2001_v51 }
 0x4d2   :  { %v4058_v18 = vpop.f32.mrb[24].mxu1 }
 0x4d3   :  { %v4059_v21 = vpop.f32.mrb[25].mxu1 }
 0x4d4   :  { %v4060_v53 = vadd.f32 %v4059_v21, %v4058_v18  ;;  %v4061_v26 = vpop.f32.mrb[26].mxu1 }
 0x4d5   :  { %v4062_v54 = vpop.f32.mrb[27].mxu1 }
 0x4d6   :  { %v3482_v55 = vadd.f32 %v4060_v53, %v3442_v52 }
 0x4d8   :  { %v3975_v56 = vmul.f32 -1.442695, %v3482_v55 }
 0x4da   :  { %4717 = vpow2.f32 %v3975_v56 }
 0x4e4   :  { %v4718_v57 = vpop.eup %4717 }
 0x4e5   :  { %v3514_v59 = vadd.f32 1.0, %v4718_v57 }
 0x4e7   :  { %4719 = vrcp.f32 %v3514_v59 }
 0x4f1   :  { %v4720_v60 = vpop.eup %4719 }
 0x4f2   :  { %3535 = vst [vmem:[%s5072_s9 + $0x30] sm:$0xff] %v4720_v60 }
 0x511   :  { %v3400_v2 = vpop.f32.mrb[12].mxu0 }
 0x512   :  { %v4072_v3 = vadd.f32 %v3400_v2, %v1993_v63  ;;  %v3402_v4 = vpop.f32.mrb[13].mxu0 }
 0x513   :  { %v4073_v6 = vadd.f32 %v3402_v4, %v1997_v1  ;;  %v3404_v7 = vpop.f32.mrb[14].mxu0 }
 0x514   :  { %v3973_v8 = vmul.f32 -1.442695, %v4072_v3  ;;  %v3405_v9 = vpop.f32.mrb[15].mxu0 }
 0x515   :  { %v3974_v10 = vmul.f32 -1.442695, %v4073_v6 }
 0x516   :  { %4721 = vpow2.f32 %v3973_v8 }
 0x517   :  { %4723 = vpow2.f32 %v3974_v10 }
 0x520   :  { %v4722_v12 = vpop.eup %4721 }
 0x521   :  { %v4724_v13 = vpop.eup %4723  ;;  %v3512_v14 = vadd.f32 1.0, %v4722_v12 }
 0x522   :  { %v3513_v15 = vadd.f32 1.0, %v4724_v13 }
 0x523   :  { %4725 = vrcp.f32 %v3512_v14 }
 0x524   :  { %4727 = vrcp.f32 %v3513_v15 }
 0x52d   :  { %v4726_v24 = vpop.eup %4725 }
 0x52e   :  { %v4728_v16 = vpop.eup %4727  ;;  %3533 = vst [vmem:[%s5072_s9 + $0x20] sm:$0xff] %v4726_v24 }
 0x52f   :  { %3534 = vst [vmem:[%s5072_s9 + $0x28] sm:$0xff] %v4728_v16 }
 0x530   :  { %3545 = vsyncpa [#allocation3], 1 }
 0x531   :  { %3546 = vsyncpa [#allocation5], 1 }
 0x532   :  { %3547 = vsyncpa [#allocation8], 1 }

</bundles_post_ra>
